<compile_context>
chip_gen: v7x
topology: tpu7x:2x2x1
jax: 0.10.0
libtpu: 0.0.40
codegen_flags: <defaults>
</compile_context>

<pallas_src>
import jax
import jax.numpy as jnp
from jax.experimental import pallas as pl
from jax.experimental.pallas import tpu as pltpu

# Logical (PyTorch) layer dims and their lane-padded versions.
DIMS = [784, 512, 256, 128, 64, 10]
PAD_DIMS = [896, 512, 256, 128, 128, 128]   # every dim a multiple of 128


def _round_up(n, m):
    return ((n + m - 1) // m) * m


def _mlp_kernel(x_ref,
                w1_ref, b1_ref,
                w2_ref, b2_ref,
                w3_ref, b3_ref,
                w4_ref, b4_ref,
                w5_ref, b5_ref,
                o_ref):
    """One batch tile: 4x (bf16 matmul + f32 bias + ReLU) + final matmul + bias."""
    h = x_ref[...]                               # bf16 [TM, 896]

    h = jnp.dot(h, w1_ref[...], preferred_element_type=jnp.float32) + b1_ref[...]
    h = jnp.maximum(h, 0.0).astype(jnp.bfloat16)

    h = jnp.dot(h, w2_ref[...], preferred_element_type=jnp.float32) + b2_ref[...]
    h = jnp.maximum(h, 0.0).astype(jnp.bfloat16)

    h = jnp.dot(h, w3_ref[...], preferred_element_type=jnp.float32) + b3_ref[...]
    h = jnp.maximum(h, 0.0).astype(jnp.bfloat16)

    h = jnp.dot(h, w4_ref[...], preferred_element_type=jnp.float32) + b4_ref[...]
    h = jnp.maximum(h, 0.0).astype(jnp.bfloat16)

    h = jnp.dot(h, w5_ref[...], preferred_element_type=jnp.float32) + b5_ref[...]

    o_ref[...] = h.astype(o_ref.dtype)           # final logits stay f32


def init_params(key):
    """Params matching torch.nn.Linear, stored transposed as W^T [in, out], b [1, out].

    Init mimics PyTorch's default U(-1/sqrt(in), 1/sqrt(in)). Kept in f32; the
    wrapper casts weights to bf16 for the MXU datapath.
    """
    params = []
    for i in range(5):
        fan_in, fan_out = DIMS[i], DIMS[i + 1]
        key, kw, kb = jax.random.split(key, 3)
        bound = 1.0 / jnp.sqrt(float(fan_in))
        w = jax.random.uniform(kw, (fan_in, fan_out), jnp.float32, -bound, bound)
        b = jax.random.uniform(kb, (1, fan_out), jnp.float32, -bound, bound)
        params.append((w, b))
    return params


def _pad_params(params):
    """Zero-pad to lane-aligned shapes; weights -> bf16, biases stay f32."""
    padded = []
    for i, (w, b) in enumerate(params):
        in_p, out_p = PAD_DIMS[i], PAD_DIMS[i + 1]
        wp = jnp.pad(w, ((0, in_p - w.shape[0]), (0, out_p - w.shape[1])))
        bp = jnp.pad(b, ((0, 0), (0, out_p - b.shape[1])))
        padded.append((wp.astype(jnp.bfloat16), bp.astype(jnp.float32)))
    return padded


def _choose_tiling(B, tm_target=512):
    """Pick (TM, n_tiles) minimizing batch padding.

    * TM <= tm_target (512: halves grid-step overhead vs 256, still tiny VMEM).
    * TM is a multiple of 16 (bf16 sublane packing).
    * For B >= 256 the tile count is made even so v7x's 2 TensorCores both get
      work under the "parallel" batch axis (no-op on v5e/v6e).
    """
    n = max(1, pl.cdiv(B, tm_target))
    if n % 2 == 1 and B >= 256:
        n += 1
    tm = _round_up(pl.cdiv(B, n), 16)
    return tm, n


def net_forward(x, params, tm_target=512):
    """x: [B, 1, 28, 28] (NCHW MNIST) or anything flattening to [B, 784]."""
    x2d = x.reshape(-1, 784).astype(jnp.float32)   # x.view(-1, 784)
    B = x2d.shape[0]

    tm, n_tiles = _choose_tiling(B, tm_target)
    B_pad = tm * n_tiles

    # Lane-align K (784 -> 896), pad batch rows, cast to bf16 for the MXU.
    x_p = jnp.pad(x2d, ((0, B_pad - B), (0, PAD_DIMS[0] - 784))).astype(jnp.bfloat16)

    padded_params = _pad_params(params)
    flat_params = [t for wb in padded_params for t in wb]  # w1,b1,...,w5,b5

    # x / out tiles walk the batch; weights & biases are whole-array blocks
    # pinned in VMEM via a constant index_map, single-buffered (they never move).
    x_spec = pl.BlockSpec((tm, PAD_DIMS[0]), lambda i: (i, 0))
    out_spec = pl.BlockSpec((tm, PAD_DIMS[-1]), lambda i: (i, 0))
    param_specs = []
    for w, b in padded_params:
        param_specs.append(
            pl.BlockSpec(w.shape, lambda i: (0, 0), pipeline_mode=pl.Buffered(1)))
        param_specs.append(
            pl.BlockSpec(b.shape, lambda i: (0, 0), pipeline_mode=pl.Buffered(1)))

    flops = 2 * B_pad * sum(PAD_DIMS[i] * PAD_DIMS[i + 1] for i in range(5))
    bytes_accessed = (
        x_p.size * 2                                             # bf16 x
        + sum(w.size * 2 + b.size * 4 for w, b in padded_params)  # bf16 W, f32 b
        + B_pad * PAD_DIMS[-1] * 4                               # f32 logits
    )

    out_padded = pl.pallas_call(
        _mlp_kernel,
        out_shape=jax.ShapeDtypeStruct((B_pad, PAD_DIMS[-1]), jnp.float32),
        grid_spec=pltpu.PrefetchScalarGridSpec(
            num_scalar_prefetch=0,
            grid=(n_tiles,),
            in_specs=[x_spec] + param_specs,
            out_specs=out_spec,
        ),
        compiler_params=pltpu.CompilerParams(
            dimension_semantics=("parallel",),   # v7x: shard batch over 2 TCs
        ),
        cost_estimate=pl.CostEstimate(
            flops=flops, transcendentals=0, bytes_accessed=bytes_accessed
        ),
    )(x_p, *flat_params)

    # Drop batch padding and the lane padding of the 10-wide logits.
    return out_padded[:B, :DIMS[-1]]


def net_forward_ref(x, params):
    """Pure-JAX f32 reference for correctness checking."""
    h = x.reshape(-1, 784).astype(jnp.float32)
    for i, (w, b) in enumerate(params):
        h = h @ w + b
        if i < 4:
            h = jnp.maximum(h, 0.0)
    return h


if __name__ == "__main__":
    key = jax.random.PRNGKey(0)
    kx, kp = jax.random.split(key)

    # Small MNIST-like batch: [B, 1, 28, 28] NCHW.
    x = jax.random.normal(kx, (2, 1, 28, 28), jnp.float32)
    params = init_params(kp)

    out = net_forward(x, params)
    out = jax.block_until_ready(out)

    ref = net_forward_ref(x, params)
    assert out.shape == (2, 10), out.shape
    # bf16 operands (f32 accumulation) vs f32 reference: relaxed tolerance.
    assert jnp.allclose(out, ref, atol=5e-2, rtol=5e-2), (
        "mismatch vs reference; max abs diff = %s" % jnp.max(jnp.abs(out - ref)))

    print("KERNEL_OK")
</pallas_src>

<mosaic_0001>
module attributes {stable_mosaic.version = 11 : i64} {
  func.func @_mlp_kernel(%arg0: i32, %arg1: memref<16x896xbf16, #tpu.memory_space<vmem>>, %arg2: memref<896x512xbf16, #tpu.memory_space<vmem>>, %arg3: memref<1x512xf32, #tpu.memory_space<vmem>>, %arg4: memref<512x256xbf16, #tpu.memory_space<vmem>>, %arg5: memref<1x256xf32, #tpu.memory_space<vmem>>, %arg6: memref<256x128xbf16, #tpu.memory_space<vmem>>, %arg7: memref<1x128xf32, #tpu.memory_space<vmem>>, %arg8: memref<128x128xbf16, #tpu.memory_space<vmem>>, %arg9: memref<1x128xf32, #tpu.memory_space<vmem>>, %arg10: memref<128x128xbf16, #tpu.memory_space<vmem>>, %arg11: memref<1x128xf32, #tpu.memory_space<vmem>>, %arg12: memref<16x128xf32, #tpu.memory_space<vmem>>) attributes {dimension_semantics = [#tpu.dimension_semantics<parallel>], iteration_bounds = array<i64: 1>, scalar_prefetch = 0 : i64, scratch_operands = 0 : i64, tpu.core_type = #tpu.core_type<tc>, window_params = [{transform_indices = @transform_0, window_bounds = array<i64: 16, 896>}, {pipeline_mode = #tpu.pipeline_mode<synchronous>, transform_indices = @transform_1, window_bounds = array<i64: 896, 512>}, {pipeline_mode = #tpu.pipeline_mode<synchronous>, transform_indices = @transform_2, window_bounds = array<i64: 1, 512>}, {pipeline_mode = #tpu.pipeline_mode<synchronous>, transform_indices = @transform_3, window_bounds = array<i64: 512, 256>}, {pipeline_mode = #tpu.pipeline_mode<synchronous>, transform_indices = @transform_4, window_bounds = array<i64: 1, 256>}, {pipeline_mode = #tpu.pipeline_mode<synchronous>, transform_indices = @transform_5, window_bounds = array<i64: 256, 128>}, {pipeline_mode = #tpu.pipeline_mode<synchronous>, transform_indices = @transform_6, window_bounds = array<i64: 1, 128>}, {pipeline_mode = #tpu.pipeline_mode<synchronous>, transform_indices = @transform_7, window_bounds = array<i64: 128, 128>}, {pipeline_mode = #tpu.pipeline_mode<synchronous>, transform_indices = @transform_8, window_bounds = array<i64: 1, 128>}, {pipeline_mode = #tpu.pipeline_mode<synchronous>, transform_indices = @transform_9, window_bounds = array<i64: 128, 128>}, {pipeline_mode = #tpu.pipeline_mode<synchronous>, transform_indices = @transform_10, window_bounds = array<i64: 1, 128>}, {transform_indices = @transform_11, window_bounds = array<i64: 16, 128>}]} {
    %c0 = arith.constant 0 : index
    %c0_0 = arith.constant 0 : index
    %0 = vector.load %arg1[%c0, %c0_0] : memref<16x896xbf16, #tpu.memory_space<vmem>>, vector<16x896xbf16>
    %c0_1 = arith.constant 0 : index
    %c0_2 = arith.constant 0 : index
    %1 = vector.load %arg2[%c0_1, %c0_2] : memref<896x512xbf16, #tpu.memory_space<vmem>>, vector<896x512xbf16>
    %cst = arith.constant dense<0.000000e+00> : vector<16x512xf32>
    %2 = tpu.matmul %0, %1, %cst {dimension_numbers = #tpu.dot_dimension_numbers<[1], [0], [0], [1], [0, 0, 1, 1], [], []>} : vector<16x896xbf16>, vector<896x512xbf16>, vector<16x512xf32> -> vector<16x512xf32>
    %c0_3 = arith.constant 0 : index
    %c0_4 = arith.constant 0 : index
    %3 = vector.load %arg3[%c0_3, %c0_4] : memref<1x512xf32, #tpu.memory_space<vmem>>, vector<1x512xf32>
    %4 = vector.broadcast %3 : vector<1x512xf32> to vector<16x512xf32>
    %5 = arith.addf %2, %4 : vector<16x512xf32>
    %cst_5 = arith.constant 0.000000e+00 : f32
    %6 = vector.broadcast %cst_5 : f32 to vector<16x512xf32>
    %7 = arith.maximumf %5, %6 : vector<16x512xf32>
    %8 = arith.truncf %7 : vector<16x512xf32> to vector<16x512xbf16>
    %c0_6 = arith.constant 0 : index
    %c0_7 = arith.constant 0 : index
    %9 = vector.load %arg4[%c0_6, %c0_7] : memref<512x256xbf16, #tpu.memory_space<vmem>>, vector<512x256xbf16>
    %cst_8 = arith.constant dense<0.000000e+00> : vector<16x256xf32>
    %10 = tpu.matmul %8, %9, %cst_8 {dimension_numbers = #tpu.dot_dimension_numbers<[1], [0], [0], [1], [0, 0, 1, 1], [], []>} : vector<16x512xbf16>, vector<512x256xbf16>, vector<16x256xf32> -> vector<16x256xf32>
    %c0_9 = arith.constant 0 : index
    %c0_10 = arith.constant 0 : index
    %11 = vector.load %arg5[%c0_9, %c0_10] : memref<1x256xf32, #tpu.memory_space<vmem>>, vector<1x256xf32>
    %12 = vector.broadcast %11 : vector<1x256xf32> to vector<16x256xf32>
    %13 = arith.addf %10, %12 : vector<16x256xf32>
    %cst_11 = arith.constant 0.000000e+00 : f32
    %14 = vector.broadcast %cst_11 : f32 to vector<16x256xf32>
    %15 = arith.maximumf %13, %14 : vector<16x256xf32>
    %16 = arith.truncf %15 : vector<16x256xf32> to vector<16x256xbf16>
    %c0_12 = arith.constant 0 : index
    %c0_13 = arith.constant 0 : index
    %17 = vector.load %arg6[%c0_12, %c0_13] : memref<256x128xbf16, #tpu.memory_space<vmem>>, vector<256x128xbf16>
    %cst_14 = arith.constant dense<0.000000e+00> : vector<16x128xf32>
    %18 = tpu.matmul %16, %17, %cst_14 {dimension_numbers = #tpu.dot_dimension_numbers<[1], [0], [0], [1], [0, 0, 1, 1], [], []>} : vector<16x256xbf16>, vector<256x128xbf16>, vector<16x128xf32> -> vector<16x128xf32>
    %c0_15 = arith.constant 0 : index
    %c0_16 = arith.constant 0 : index
    %19 = vector.load %arg7[%c0_15, %c0_16] : memref<1x128xf32, #tpu.memory_space<vmem>>, vector<1x128xf32>
    %20 = vector.broadcast %19 : vector<1x128xf32> to vector<16x128xf32>
    %21 = arith.addf %18, %20 : vector<16x128xf32>
    %cst_17 = arith.constant 0.000000e+00 : f32
    %22 = vector.broadcast %cst_17 : f32 to vector<16x128xf32>
    %23 = arith.maximumf %21, %22 : vector<16x128xf32>
    %24 = arith.truncf %23 : vector<16x128xf32> to vector<16x128xbf16>
    %c0_18 = arith.constant 0 : index
    %c0_19 = arith.constant 0 : index
    %25 = vector.load %arg8[%c0_18, %c0_19] : memref<128x128xbf16, #tpu.memory_space<vmem>>, vector<128x128xbf16>
    %cst_20 = arith.constant dense<0.000000e+00> : vector<16x128xf32>
    %26 = tpu.matmul %24, %25, %cst_20 {dimension_numbers = #tpu.dot_dimension_numbers<[1], [0], [0], [1], [0, 0, 1, 1], [], []>} : vector<16x128xbf16>, vector<128x128xbf16>, vector<16x128xf32> -> vector<16x128xf32>
    %c0_21 = arith.constant 0 : index
    %c0_22 = arith.constant 0 : index
    %27 = vector.load %arg9[%c0_21, %c0_22] : memref<1x128xf32, #tpu.memory_space<vmem>>, vector<1x128xf32>
    %28 = vector.broadcast %27 : vector<1x128xf32> to vector<16x128xf32>
    %29 = arith.addf %26, %28 : vector<16x128xf32>
    %cst_23 = arith.constant 0.000000e+00 : f32
    %30 = vector.broadcast %cst_23 : f32 to vector<16x128xf32>
    %31 = arith.maximumf %29, %30 : vector<16x128xf32>
    %32 = arith.truncf %31 : vector<16x128xf32> to vector<16x128xbf16>
    %c0_24 = arith.constant 0 : index
    %c0_25 = arith.constant 0 : index
    %33 = vector.load %arg10[%c0_24, %c0_25] : memref<128x128xbf16, #tpu.memory_space<vmem>>, vector<128x128xbf16>
    %cst_26 = arith.constant dense<0.000000e+00> : vector<16x128xf32>
    %34 = tpu.matmul %32, %33, %cst_26 {dimension_numbers = #tpu.dot_dimension_numbers<[1], [0], [0], [1], [0, 0, 1, 1], [], []>} : vector<16x128xbf16>, vector<128x128xbf16>, vector<16x128xf32> -> vector<16x128xf32>
    %c0_27 = arith.constant 0 : index
    %c0_28 = arith.constant 0 : index
    %35 = vector.load %arg11[%c0_27, %c0_28] : memref<1x128xf32, #tpu.memory_space<vmem>>, vector<1x128xf32>
    %36 = vector.broadcast %35 : vector<1x128xf32> to vector<16x128xf32>
    %37 = arith.addf %34, %36 : vector<16x128xf32>
    %c0_29 = arith.constant 0 : index
    %c0_30 = arith.constant 0 : index
    %38 = vector.load %arg12[%c0_29, %c0_30] : memref<16x128xf32, #tpu.memory_space<vmem>>, vector<16x128xf32>
    tpu.vector_store %arg12[%c0_29, %c0_30], %37 {strides = array<i32>} : memref<16x128xf32, #tpu.memory_space<vmem>>, vector<16x128xf32>,
    return
  }
  func.func @transform_0(%arg0: i32) -> (i32, i32) {
    %c0_i32 = arith.constant 0 : i32
    %c0_i32_0 = arith.constant 0 : i32
    return %arg0, %c0_i32 : i32, i32
  }
  func.func @transform_1(%arg0: i32) -> (i32, i32) {
    %c0_i32 = arith.constant 0 : i32
    %c0_i32_0 = arith.constant 0 : i32
    %c0_i32_1 = arith.constant 0 : i32
    return %c0_i32, %c0_i32_0 : i32, i32
  }
  func.func @transform_2(%arg0: i32) -> (i32, i32) {
    %c0_i32 = arith.constant 0 : i32
    %c0_i32_0 = arith.constant 0 : i32
    %c0_i32_1 = arith.constant 0 : i32
    return %c0_i32, %c0_i32_0 : i32, i32
  }
  func.func @transform_3(%arg0: i32) -> (i32, i32) {
    %c0_i32 = arith.constant 0 : i32
    %c0_i32_0 = arith.constant 0 : i32
    %c0_i32_1 = arith.constant 0 : i32
    return %c0_i32, %c0_i32_0 : i32, i32
  }
  func.func @transform_4(%arg0: i32) -> (i32, i32) {
    %c0_i32 = arith.constant 0 : i32
    %c0_i32_0 = arith.constant 0 : i32
    %c0_i32_1 = arith.constant 0 : i32
    return %c0_i32, %c0_i32_0 : i32, i32
  }
  func.func @transform_5(%arg0: i32) -> (i32, i32) {
    %c0_i32 = arith.constant 0 : i32
    %c0_i32_0 = arith.constant 0 : i32
    %c0_i32_1 = arith.constant 0 : i32
    return %c0_i32, %c0_i32_0 : i32, i32
  }
  func.func @transform_6(%arg0: i32) -> (i32, i32) {
    %c0_i32 = arith.constant 0 : i32
    %c0_i32_0 = arith.constant 0 : i32
    %c0_i32_1 = arith.constant 0 : i32
    return %c0_i32, %c0_i32_0 : i32, i32
  }
  func.func @transform_7(%arg0: i32) -> (i32, i32) {
    %c0_i32 = arith.constant 0 : i32
    %c0_i32_0 = arith.constant 0 : i32
    %c0_i32_1 = arith.constant 0 : i32
    return %c0_i32, %c0_i32_0 : i32, i32
  }
  func.func @transform_8(%arg0: i32) -> (i32, i32) {
    %c0_i32 = arith.constant 0 : i32
    %c0_i32_0 = arith.constant 0 : i32
    %c0_i32_1 = arith.constant 0 : i32
    return %c0_i32, %c0_i32_0 : i32, i32
  }
  func.func @transform_9(%arg0: i32) -> (i32, i32) {
    %c0_i32 = arith.constant 0 : i32
    %c0_i32_0 = arith.constant 0 : i32
    %c0_i32_1 = arith.constant 0 : i32
    return %c0_i32, %c0_i32_0 : i32, i32
  }
  func.func @transform_10(%arg0: i32) -> (i32, i32) {
    %c0_i32 = arith.constant 0 : i32
    %c0_i32_0 = arith.constant 0 : i32
    %c0_i32_1 = arith.constant 0 : i32
    return %c0_i32, %c0_i32_0 : i32, i32
  }
  func.func @transform_11(%arg0: i32) -> (i32, i32) {
    %c0_i32 = arith.constant 0 : i32
    %c0_i32_0 = arith.constant 0 : i32
    return %arg0, %c0_i32 : i32, i32
  }
}

</mosaic_0001>

<bundles_post_ra>
// kernel: tpu_custom_call.1
= control target key start
LH: loop header
LB: loop body
LE: loop exit
PB: predicated region body
PF: predicated region fallthrough
CT: control target
= control target key end

     0   :  { %16 = vsyncpa [#allocation3], 0  ;;  %s4146_s0 = inlined_call_operand.hbm [shape: bf16[16,896], index: 0, kind: input, shape index: {}]   ;;  %s4147_s1 = inlined_call_operand.hbm [shape: bf16[896,512], index: 1, kind: input, shape index: {}]   ;;  %s4148_s2 = inlined_call_operand.vmem [shape: f32[1,512], index: 2, kind: input, shape index: {}]   ;;  %s4149_s3 = inlined_call_operand.hbm [shape: bf16[512,256], index: 3, kind: input, shape index: {}]   ;;  %s4150_s4 = inlined_call_operand.vmem [shape: f32[1,256], index: 4, kind: input, shape index: {}]   ;;  %s4151_s5 = inlined_call_operand.hbm [shape: bf16[256,128], index: 5, kind: input, shape index: {}]   ;;  %s4152_s6 = inlined_call_operand.vmem [shape: f32[1,128], index: 6, kind: input, shape index: {}]   ;;  %s4153_s7 = inlined_call_operand.hbm [shape: bf16[128,128], index: 7, kind: input, shape index: {}]   ;;  %s4154_s8 = inlined_call_operand.vmem [shape: f32[1,128], index: 8, kind: input, shape index: {}]   ;;  %s4155_s9 = inlined_call_operand.hbm [shape: bf16[128,128], index: 9, kind: input, shape index: {}]   ;;  %s4156_s10 = inlined_call_operand.vmem [shape: f32[1,128], index: 10, kind: input, shape index: {}]   ;;  %s4157_s11 = inlined_call_operand.hbm [shape: f32[16,128], index: 11, kind: output, shape index: {}]  }
   0x1   :  { %17 = vsyncpa [#allocation6], 0 }
   0x2   :  { %18 = vsyncpa [#allocation9], 0 }
   0x3   :  { %19 = vsyncpa [#allocation12], 0 }
   0x4   :  { %20 = vsyncpa [#allocation4], 0  ;;  %s3910_s17 = smov [#allocation5]   ;;  %s3746_s21 = scalar_lea.hbm %s4147_s1, 28672 }
   0x5   :  { %s38_s18 = sshll.u32 %s3910_s17, 4  ;;  %p3747_p0 = scmp.ne.s32.totalorder %s4147_s1, %s3746_s21  ;;  %s39_s18 = int_to_ptr.vmem [resolvable:$true] %s38_s18 }
   0x6   :  { %p3750_p1 = scmp.lt.u32.totalorder %s3746_s21, %s4147_s1 }
   0x8   :  { %p3752_p2 = pnand %p3750_p1, %p3747_p0 }
   0xa   :  { %3755 = shalt.err (!%p3752_p2)
}
   0xb   :  { %s3756_s26 = scalar_lea.vmem %s39_s18, 28672  ;;  %p3761_p4 = scmp.lt.s32.totalorder %s39_s18, %s39_s18 }
   0xc   :  { %p3757_p3 = scmp.ne.s32.totalorder %s39_s18, %s3756_s26  ;;  %p3762_p5 = scmp.lt.s32.totalorder %s3756_s26, %s3756_s26 }
   0xe   :  { %p3763_p6 = por %p3762_p5, %p3761_p4 }
  0x10   :  { %p3764_p7 = pnand %p3763_p6, %p3757_p3 }
  0x12   :  { %3767 = shalt.err (!%p3764_p7)
}
  0x13   :  { %s3911_s27 = smov 256   ;;  %s3912_s28 = smov 16  }
  0x14   :  { %44 = dma.hbm_to_vmem [thread:$0]  %s4147_s1, 28672, %s39_s18, [#allocation6], %s3911_s27, %s3911_s27, %s3912_s28  }
  0x15   :  { %s3913_s12 = smov [#allocation8]   ;;  %s3768_s16 = scalar_lea.hbm %s4151_s5, 2048 }
  0x16   :  { %s66_s13 = sshll.u32 %s3913_s12, 4  ;;  %p3769_p8 = scmp.ne.s32.totalorder %s4151_s5, %s3768_s16  ;;  %s67_s13 = int_to_ptr.vmem [resolvable:$true] %s66_s13 }
  0x17   :  { %p3772_p9 = scmp.lt.u32.totalorder %s3768_s16, %s4151_s5 }
  0x19   :  { %p3774_p10 = pnand %p3772_p9, %p3769_p8 }
  0x1b   :  { %3777 = shalt.err (!%p3774_p10)
}
  0x1c   :  { %s3778_s22 = scalar_lea.vmem %s67_s13, 2048  ;;  %p3783_p12 = scmp.lt.s32.totalorder %s67_s13, %s67_s13 }
  0x1d   :  { %p3779_p11 = scmp.ne.s32.totalorder %s67_s13, %s3778_s22  ;;  %p3784_p13 = scmp.lt.s32.totalorder %s3778_s22, %s3778_s22 }
  0x1f   :  { %p3785_p0 = por %p3784_p13, %p3783_p12 }
  0x21   :  { %p3786_p1 = pnand %p3785_p0, %p3779_p11 }
  0x23   :  { %3789 = shalt.err (!%p3786_p1)
}
  0x24   :  { %s3914_s1 = smov 64   ;;  %s3915_s18 = smov 4  }
  0x25   :  { %72 = dma.hbm_to_vmem [thread:$0]  %s4151_s5, 2048, %s67_s13, [#allocation9], %s3914_s1, %s3914_s1, %s3915_s18  }
  0x26   :  { %s3916_s25 = smov [#allocation2]   ;;  %s3790_s29 = scalar_lea.hbm %s4146_s0, 896 }
  0x27   :  { %s26_s26 = sshll.u32 %s3916_s25, 4  ;;  %p3791_p2 = scmp.ne.s32.totalorder %s4146_s0, %s3790_s29  ;;  %s27_s26 = int_to_ptr.vmem [resolvable:$true] %s26_s26 }
  0x28   :  { %p3794_p3 = scmp.lt.u32.totalorder %s3790_s29, %s4146_s0 }
  0x2a   :  { %p3796_p4 = pnand %p3794_p3, %p3791_p2 }
  0x2c   :  { %3799 = shalt.err (!%p3796_p4)
}
  0x2d   :  { %s3800_s16 = scalar_lea.vmem %s27_s26, 896  ;;  %p3805_p6 = scmp.lt.s32.totalorder %s27_s26, %s27_s26 }
  0x2e   :  { %p3801_p5 = scmp.ne.s32.totalorder %s27_s26, %s3800_s16  ;;  %p3806_p7 = scmp.lt.s32.totalorder %s3800_s16, %s3800_s16 }
  0x30   :  { %p3807_p8 = por %p3806_p7, %p3805_p6 }
  0x32   :  { %p3808_p9 = pnand %p3807_p8, %p3801_p5 }
  0x34   :  { %3811 = shalt.err (!%p3808_p9)
}
  0x35   :  { %s3917_s5 = smov 448   ;;  %s3918_s13 = smov 28  }
  0x36   :  { %32 = dma.hbm_to_vmem [thread:$0]  %s4146_s0, 896, %s27_s26, [#allocation3], %s3917_s5, %s3917_s5, %s3918_s13  }
  0x37   :  { %s3919_s20 = smov [#allocation7]   ;;  %s3812_s24 = scalar_lea.hbm %s4149_s3, 8192 }
  0x38   :  { %s52_s21 = sshll.u32 %s3919_s20, 4  ;;  %p3813_p10 = scmp.ne.s32.totalorder %s4149_s3, %s3812_s24  ;;  %s53_s21 = int_to_ptr.vmem [resolvable:$true] %s52_s21 }
  0x39   :  { %p3816_p11 = scmp.lt.u32.totalorder %s3812_s24, %s4149_s3 }
  0x3b   :  { %p3818_p12 = pnand %p3816_p11, %p3813_p10 }
  0x3d   :  { %3821 = shalt.err (!%p3818_p12)
}
  0x3e   :  { %s3822_s30 = scalar_lea.vmem %s53_s21, 8192  ;;  %p3827_p0 = scmp.lt.s32.totalorder %s53_s21, %s53_s21 }
  0x3f   :  { %p3823_p13 = scmp.ne.s32.totalorder %s53_s21, %s3822_s30  ;;  %p3828_p1 = scmp.lt.s32.totalorder %s3822_s30, %s3822_s30 }
  0x41   :  { %p3829_p2 = por %p3828_p1, %p3827_p0 }
  0x43   :  { %p3830_p3 = pnand %p3829_p2, %p3823_p13 }
  0x45   :  { %3833 = shalt.err (!%p3830_p3)
}
  0x46   :  { %s3920_s0 = smov 128   ;;  %s3921_s26 = smov 8  }
  0x47   :  { %58 = dma.hbm_to_vmem [thread:$0]  %s4149_s3, 8192, %s53_s21, [#allocation6], %s3920_s0, %s3920_s0, %s3921_s26  }
  0x48   :  { %s3922_s15 = smov [#allocation10]   ;;  %s3923_s5 = smov [#allocation11]  }
  0x49   :  { %s80_s16 = sshll.u32 %s3922_s15, 4  ;;  %s94_s13 = sshll.u32 %s3923_s5, 4  ;;  %s81_s16 = int_to_ptr.vmem [resolvable:$true] %s80_s16  ;;  %s4042_s13 = int_to_ptr.vmem [resolvable:$true] %s94_s13 }
  0x4a   :  { %s3834_s20 = scalar_lea.hbm %s4153_s7, 1024 }
  0x4b   :  { %p3835_p4 = scmp.ne.s32.totalorder %s4153_s7, %s3834_s20  ;;  %p3838_p5 = scmp.lt.u32.totalorder %s3834_s20, %s4153_s7 }
  0x4d   :  { %p3840_p6 = pnand %p3838_p5, %p3835_p4 }
  0x4f   :  { %3843 = shalt.err (!%p3840_p6)
}
  0x50   :  { %s3844_s3 = scalar_lea.vmem %s81_s16, 1024  ;;  %p3849_p8 = scmp.lt.s32.totalorder %s81_s16, %s81_s16 }
  0x51   :  { %p3845_p7 = scmp.ne.s32.totalorder %s81_s16, %s3844_s3  ;;  %p3850_p9 = scmp.lt.s32.totalorder %s3844_s3, %s3844_s3 }
  0x53   :  { %p3851_p10 = por %p3850_p9, %p3849_p8 }
  0x55   :  { %p3852_p11 = pnand %p3851_p10, %p3845_p7 }
  0x57   :  { %3855 = shalt.err (!%p3852_p11)
}
  0x58   :  { %86 = dma.hbm_to_vmem [thread:$0]  %s4153_s7, 1024, %s81_s16, [#allocation9], %s3914_s1, %s3914_s1, %s3915_s18  }
  0x59   :  { %s3856_s30 = scalar_lea.hbm %s4155_s9, 1024 }
  0x5a   :  { %p3857_p12 = scmp.ne.s32.totalorder %s4155_s9, %s3856_s30  ;;  %p3860_p13 = scmp.lt.u32.totalorder %s3856_s30, %s4155_s9 }
  0x5c   :  { %p3862_p0 = pnand %p3860_p13, %p3857_p12 }
  0x5e   :  { %3865 = shalt.err (!%p3862_p0)
}
  0x5f   :  { %s3866_s17 = scalar_lea.vmem %s4042_s13, 1024  ;;  %p3871_p2 = scmp.lt.s32.totalorder %s4042_s13, %s4042_s13 }
  0x60   :  { %p3867_p1 = scmp.ne.s32.totalorder %s4042_s13, %s3866_s17  ;;  %p3872_p3 = scmp.lt.s32.totalorder %s3866_s17, %s3866_s17 }
  0x62   :  { %p3873_p4 = por %p3872_p3, %p3871_p2 }
  0x64   :  { %p3874_p5 = pnand %p3873_p4, %p3867_p1 }
  0x66   :  { %3877 = shalt.err (!%p3874_p5)
}
  0x67   :  { %100 = dma.hbm_to_vmem [thread:$0]  %s4155_s9, 1024, %s4042_s13, [#allocation12], %s3914_s1, %s3914_s1, %s3915_s18  }
  0x68   :  { %3900 = dma.done.wait [#allocation3], 896  }
  0x69   :  { %3901 = vsyncadd [#allocation3], 4294966400 }
  0x6a   :  { %3902 = dma.done.wait [#allocation6], 36864  }
  0x6b   :  { %3903 = vsyncadd [#allocation6], 4294930432 }
  0x6c   :  { %3904 = dma.done.wait [#allocation9], 3072  }
  0x6d   :  { %3905 = vsyncadd [#allocation9], 4294964224 }
  0x6e   :  { %3906 = dma.done.wait [#allocation12], 1024  }
  0x6f   :  { %3907 = vsyncadd [#allocation12], 4294966272  ;;  %v3272_v0 = vld [vmem:[#allocation5 + $0x4] ss:$16 sps:$4 sm:$0xff]   ;;  %v3274_v1 = vld [vmem:[#allocation5 + $0xc] ss:$16 sps:$4 sm:$0xff]  }
  0x70   :  { %1532 = vmatprep.subr.bf16.mxu0 %v3272_v0  ;;  %v3276_v2 = vld [vmem:[#allocation5] ss:$16 sps:$4 sm:$0xff]   ;;  %v3277_v3 = vld [vmem:[#allocation5 + $0x8] ss:$16 sps:$4 sm:$0xff]   ;;  %1704 = vmatprep.subr.bf16.mxu1 %v3274_v1  ;;  %v3278_v4 = vld [vmem:[#allocation5 + $0x24] ss:$16 sps:$4 sm:$0xff]  }
  0x71   :  { %1533 = vmatpush1.bf16.msra.mxu0 %v3276_v2  ;;  %1705 = vmatpush1.bf16.msra.mxu1 %v3277_v3  ;;  %v3280_v5 = vld [vmem:[#allocation5 + $0x2c] ss:$16 sps:$4 sm:$0xff]   ;;  %v3282_v6 = vld [vmem:[#allocation5 + $0x20] ss:$16 sps:$4 sm:$0xff]   ;;  %v3283_v7 = vld [vmem:[#allocation5 + $0x28] ss:$16 sps:$4 sm:$0xff]  }
  0x72   :  { %1534 = vmatprep.subr.bf16.mxu0 %v3278_v4  ;;  %1706 = vmatprep.subr.bf16.mxu1 %v3280_v5  ;;  %v3284_v8 = vld [vmem:[#allocation5 + $0x44] ss:$16 sps:$4 sm:$0xff]   ;;  %v3286_v9 = vld [vmem:[#allocation5 + $0x4c] ss:$16 sps:$4 sm:$0xff]   ;;  %v3288_v10 = vld [vmem:[#allocation5 + $0x40] ss:$16 sps:$4 sm:$0xff]  }
  0x73   :  { %v3289_v11 = vld [vmem:[#allocation5 + $0x48] ss:$16 sps:$4 sm:$0xff]   ;;  %v3290_v12 = vld [vmem:[#allocation5 + $0x64] ss:$16 sps:$4 sm:$0xff]   ;;  %v3292_v13 = vld [vmem:[#allocation5 + $0x6c] ss:$16 sps:$4 sm:$0xff]  }
  0x74   :  { %v3294_v14 = vld [vmem:[#allocation5 + $0x60] ss:$16 sps:$4 sm:$0xff]   ;;  %v3295_v15 = vld [vmem:[#allocation5 + $0x68] ss:$16 sps:$4 sm:$0xff]   ;;  %v3296_v16 = vld [vmem:[#allocation5 + $0x84] ss:$16 sps:$4 sm:$0xff]  }
  0x75   :  { %1535 = vmatpush1.bf16.msra.mxu0 %v3282_v6  ;;  %1707 = vmatpush1.bf16.msra.mxu1 %v3283_v7  ;;  %v3298_v17 = vld [vmem:[#allocation5 + $0x8c] ss:$16 sps:$4 sm:$0xff]   ;;  %v3300_v18 = vld [vmem:[#allocation5 + $0x80] ss:$16 sps:$4 sm:$0xff]   ;;  %v3301_v19 = vld [vmem:[#allocation5 + $0x88] ss:$16 sps:$4 sm:$0xff]  }
  0x76   :  { %1536 = vmatprep.subr.bf16.mxu0 %v3284_v8  ;;  %1708 = vmatprep.subr.bf16.mxu1 %v3286_v9  ;;  %v3302_v20 = vld [vmem:[#allocation5 + $0xa4] ss:$16 sps:$4 sm:$0xff]   ;;  %v3304_v21 = vld [vmem:[#allocation5 + $0xac] ss:$16 sps:$4 sm:$0xff]   ;;  %v3306_v22 = vld [vmem:[#allocation5 + $0xa0] ss:$16 sps:$4 sm:$0xff]  }
  0x77   :  { %v3307_v23 = vld [vmem:[#allocation5 + $0xa8] ss:$16 sps:$4 sm:$0xff]   ;;  %v3308_v24 = vld [vmem:[#allocation5 + $0xc4] ss:$16 sps:$4 sm:$0xff]   ;;  %v3310_v25 = vld [vmem:[#allocation5 + $0xcc] ss:$16 sps:$4 sm:$0xff]  }
  0x78   :  { %v3312_v26 = vld [vmem:[#allocation5 + $0xc0] ss:$16 sps:$4 sm:$0xff]   ;;  %v3313_v27 = vld [vmem:[#allocation5 + $0xc8] ss:$16 sps:$4 sm:$0xff]   ;;  %v3314_v28 = vld [vmem:[#allocation5 + $0xe4] ss:$16 sps:$4 sm:$0xff]  }
  0x79   :  { %1537 = vmatpush1.bf16.msra.mxu0 %v3288_v10  ;;  %1709 = vmatpush1.bf16.msra.mxu1 %v3289_v11  ;;  %v3316_v29 = vld [vmem:[#allocation5 + $0xec] ss:$16 sps:$4 sm:$0xff]   ;;  %v3318_v30 = vld [vmem:[#allocation5 + $0xe0] ss:$16 sps:$4 sm:$0xff]   ;;  %v3319_v31 = vld [vmem:[#allocation5 + $0xe8] ss:$16 sps:$4 sm:$0xff]  }
  0x7a   :  { %1538 = vmatprep.subr.bf16.mxu0 %v3290_v12  ;;  %1710 = vmatprep.subr.bf16.mxu1 %v3292_v13  ;;  %v3320_v32 = vld [vmem:[#allocation5 + $0x104] ss:$16 sps:$4 sm:$0xff]   ;;  %v3322_v33 = vld [vmem:[#allocation5 + $0x10c] ss:$16 sps:$4 sm:$0xff]   ;;  %v3324_v34 = vld [vmem:[#allocation5 + $0x100] ss:$16 sps:$4 sm:$0xff]  }
  0x7b   :  { %v3325_v35 = vld [vmem:[#allocation5 + $0x108] ss:$16 sps:$4 sm:$0xff]   ;;  %v3326_v36 = vld [vmem:[#allocation5 + $0x124] ss:$16 sps:$4 sm:$0xff]   ;;  %v3328_v37 = vld [vmem:[#allocation5 + $0x12c] ss:$16 sps:$4 sm:$0xff]  }
  0x7c   :  { %v3330_v38 = vld [vmem:[#allocation5 + $0x120] ss:$16 sps:$4 sm:$0xff]   ;;  %v3331_v39 = vld [vmem:[#allocation5 + $0x128] ss:$16 sps:$4 sm:$0xff]   ;;  %v3332_v40 = vld [vmem:[#allocation5 + $0x144] ss:$16 sps:$4 sm:$0xff]  }
  0x7d   :  { %1539 = vmatpush1.bf16.msra.mxu0 %v3294_v14  ;;  %1711 = vmatpush1.bf16.msra.mxu1 %v3295_v15  ;;  %v3334_v41 = vld [vmem:[#allocation5 + $0x14c] ss:$16 sps:$4 sm:$0xff]   ;;  %v3336_v42 = vld [vmem:[#allocation5 + $0x140] ss:$16 sps:$4 sm:$0xff]   ;;  %v3337_v43 = vld [vmem:[#allocation5 + $0x148] ss:$16 sps:$4 sm:$0xff]  }
  0x7e   :  { %1540 = vmatprep.subr.bf16.mxu0 %v3296_v16  ;;  %1712 = vmatprep.subr.bf16.mxu1 %v3298_v17  ;;  %v3338_v44 = vld [vmem:[#allocation5 + $0x164] ss:$16 sps:$4 sm:$0xff]   ;;  %v3340_v45 = vld [vmem:[#allocation5 + $0x16c] ss:$16 sps:$4 sm:$0xff]   ;;  %v3342_v46 = vld [vmem:[#allocation5 + $0x160] ss:$16 sps:$4 sm:$0xff]  }
  0x7f   :  { %v3343_v47 = vld [vmem:[#allocation5 + $0x168] ss:$16 sps:$4 sm:$0xff]   ;;  %v3344_v49 = vld [vmem:[#allocation5 + $0x184] ss:$16 sps:$4 sm:$0xff]   ;;  %v3346_v50 = vld [vmem:[#allocation5 + $0x18c] ss:$16 sps:$4 sm:$0xff]  }
  0x80   :  { %v3370_v48 = vld [vmem:[#allocation2 + $0x4] ss:$28 sps:$4 sm:$0xff]   ;;  %v3348_v51 = vld [vmem:[#allocation5 + $0x180] ss:$16 sps:$4 sm:$0xff]   ;;  %v3350_v53 = vld [vmem:[#allocation5 + $0x1a4] ss:$16 sps:$4 sm:$0xff]  }
  0x81   :  { %1541 = vmatpush1.bf16.msra.mxu0 %v3300_v18  ;;  %1713 = vmatpush1.bf16.msra.mxu1 %v3301_v19  ;;  %v3349_v52 = vld [vmem:[#allocation5 + $0x188] ss:$16 sps:$4 sm:$0xff]   ;;  %v3352_v54 = vld [vmem:[#allocation5 + $0x1ac] ss:$16 sps:$4 sm:$0xff]   ;;  %v3354_v55 = vld [vmem:[#allocation5 + $0x1a0] ss:$16 sps:$4 sm:$0xff]  }
  0x82   :  { %1542 = vmatprep.subr.bf16.mxu0 %v3302_v20  ;;  %1714 = vmatprep.subr.bf16.mxu1 %v3304_v21  ;;  %v3355_v56 = vld [vmem:[#allocation5 + $0x1a8] ss:$16 sps:$4 sm:$0xff]   ;;  %v3356_v57 = vld [vmem:[#allocation5 + $0x1c4] ss:$16 sps:$4 sm:$0xff]   ;;  %v3358_v58 = vld [vmem:[#allocation5 + $0x1cc] ss:$16 sps:$4 sm:$0xff]  }
  0x83   :  { %1564 = vmatprep.mubr.bf16.mxu0 %v3370_v48  ;;  %1736 = vmatprep.mubr.bf16.mxu1 %v3370_v48  ;;  %v3360_v59 = vld [vmem:[#allocation5 + $0x1c0] ss:$16 sps:$4 sm:$0xff]   ;;  %v3361_v60 = vld [vmem:[#allocation5 + $0x1c8] ss:$16 sps:$4 sm:$0xff]   ;;  %v3362_v61 = vld [vmem:[#allocation5 + $0x1e4] ss:$16 sps:$4 sm:$0xff]  }
  0x84   :  { %v3364_v62 = vld [vmem:[#allocation5 + $0x1ec] ss:$16 sps:$4 sm:$0xff]   ;;  %v3366_v63 = vld [vmem:[#allocation5 + $0x1e0] ss:$16 sps:$4 sm:$0xff]   ;;  %v3367_v0 = vld [vmem:[#allocation5 + $0x1e8] ss:$16 sps:$4 sm:$0xff]  }
  0x85   :  { %1543 = vmatpush1.bf16.msra.mxu0 %v3306_v22  ;;  %1715 = vmatpush1.bf16.msra.mxu1 %v3307_v23  ;;  %v3373_v1 = vld [vmem:[#allocation5 + $0x204] ss:$16 sps:$4 sm:$0xff]   ;;  %v3376_v2 = vld [vmem:[#allocation5 + $0x20c] ss:$16 sps:$4 sm:$0xff]   ;;  %v3371_v4 = vld [vmem:[#allocation5 + $0x200] ss:$16 sps:$4 sm:$0xff]  }
  0x86   :  { %1544 = vmatprep.subr.bf16.mxu0 %v3308_v24  ;;  %1716 = vmatprep.subr.bf16.mxu1 %v3310_v25  ;;  %v3368_v3 = vld [vmem:[#allocation2] ss:$28 sps:$4 sm:$0xff]   ;;  %v3382_v7 = vld [vmem:[#allocation5 + $0x22c] ss:$16 sps:$4 sm:$0xff]   ;;  %v3377_v8 = vld [vmem:[#allocation5 + $0x220] ss:$16 sps:$4 sm:$0xff]  }
  0x87   :  { %v3374_v5 = vld [vmem:[#allocation5 + $0x208] ss:$16 sps:$4 sm:$0xff]   ;;  %v3379_v6 = vld [vmem:[#allocation5 + $0x224] ss:$16 sps:$4 sm:$0xff]   ;;  %v3388_v11 = vld [vmem:[#allocation5 + $0x24c] ss:$16 sps:$4 sm:$0xff]  }
  0x88   :  { %v3380_v9 = vld [vmem:[#allocation5 + $0x228] ss:$16 sps:$4 sm:$0xff]   ;;  %v3385_v10 = vld [vmem:[#allocation5 + $0x244] ss:$16 sps:$4 sm:$0xff]   ;;  %v3383_v12 = vld [vmem:[#allocation5 + $0x240] ss:$16 sps:$4 sm:$0xff]  }
  0x89   :  { %1545 = vmatpush1.bf16.msra.mxu0 %v3312_v26  ;;  %1717 = vmatpush1.bf16.msra.mxu1 %v3313_v27  ;;  %v3386_v13 = vld [vmem:[#allocation5 + $0x248] ss:$16 sps:$4 sm:$0xff]   ;;  %v3391_v14 = vld [vmem:[#allocation5 + $0x264] ss:$16 sps:$4 sm:$0xff]   ;;  %v3394_v15 = vld [vmem:[#allocation5 + $0x26c] ss:$16 sps:$4 sm:$0xff]  }
  0x8a   :  { %1546 = vmatprep.subr.bf16.mxu0 %v3314_v28  ;;  %1718 = vmatprep.subr.bf16.mxu1 %v3316_v29  ;;  %v3389_v16 = vld [vmem:[#allocation5 + $0x260] ss:$16 sps:$4 sm:$0xff]   ;;  %v3392_v17 = vld [vmem:[#allocation5 + $0x268] ss:$16 sps:$4 sm:$0xff]   ;;  %v3397_v18 = vld [vmem:[#allocation5 + $0x284] ss:$16 sps:$4 sm:$0xff]  }
  0x8b   :  { %v3400_v19 = vld [vmem:[#allocation5 + $0x28c] ss:$16 sps:$4 sm:$0xff]   ;;  %v3395_v20 = vld [vmem:[#allocation5 + $0x280] ss:$16 sps:$4 sm:$0xff]   ;;  %v3398_v21 = vld [vmem:[#allocation5 + $0x288] ss:$16 sps:$4 sm:$0xff]  }
  0x8c   :  { %v3403_v22 = vld [vmem:[#allocation5 + $0x2a4] ss:$16 sps:$4 sm:$0xff]   ;;  %v3406_v23 = vld [vmem:[#allocation5 + $0x2ac] ss:$16 sps:$4 sm:$0xff]   ;;  %v3401_v24 = vld [vmem:[#allocation5 + $0x2a0] ss:$16 sps:$4 sm:$0xff]  }
  0x8d   :  { %1547 = vmatpush1.bf16.msra.mxu0 %v3318_v30  ;;  %1719 = vmatpush1.bf16.msra.mxu1 %v3319_v31  ;;  %v3404_v25 = vld [vmem:[#allocation5 + $0x2a8] ss:$16 sps:$4 sm:$0xff]   ;;  %v3409_v26 = vld [vmem:[#allocation5 + $0x2c4] ss:$16 sps:$4 sm:$0xff]   ;;  %v3412_v27 = vld [vmem:[#allocation5 + $0x2cc] ss:$16 sps:$4 sm:$0xff]  }
  0x8e   :  { %1548 = vmatprep.subr.bf16.mxu0 %v3320_v32  ;;  %1720 = vmatprep.subr.bf16.mxu1 %v3322_v33  ;;  %v3407_v28 = vld [vmem:[#allocation5 + $0x2c0] ss:$16 sps:$4 sm:$0xff]   ;;  %v3410_v29 = vld [vmem:[#allocation5 + $0x2c8] ss:$16 sps:$4 sm:$0xff]   ;;  %v3415_v31 = vld [vmem:[#allocation5 + $0x2e4] ss:$16 sps:$4 sm:$0xff]  }
  0x8f   :  { %v3469_v30 = vld [vmem:[#allocation2 + $0xc] ss:$28 sps:$4 sm:$0xff]   ;;  %v3418_v32 = vld [vmem:[#allocation5 + $0x2ec] ss:$16 sps:$4 sm:$0xff]   ;;  %vm3926_vm0 = vmmov 0   ;;  %s3927_s23 = smov [#allocation13]  }
  0x90   :  { %v3413_v33 = vld [vmem:[#allocation5 + $0x2e0] ss:$16 sps:$4 sm:$0xff]   ;;  %v3442_v48 = vld [vmem:[#allocation5 + $0x36c] ss:$16 sps:$4 sm:$0xff]   ;;  %s2789_s24 = sshll.u32 %s3927_s23, 4  ;;  %s2790_s24 = int_to_ptr.vmem [resolvable:$true] %s2789_s24 }
  0x91   :  { %1549 = vmatpush1.bf16.msra.mxu0 %v3324_v34  ;;  %1721 = vmatpush1.bf16.msra.mxu1 %v3325_v35  ;;  %v3416_v34 = vld [vmem:[#allocation5 + $0x2e8] ss:$16 sps:$4 sm:$0xff]   ;;  %v3421_v35 = vld [vmem:[#allocation5 + $0x304] ss:$16 sps:$4 sm:$0xff]   ;;  %p3883_p7 = scmp.lt.s32.totalorder %s2790_s24, %s2790_s24 }
  0x92   :  { %1550 = vmatprep.subr.bf16.mxu0 %v3326_v36  ;;  %1722 = vmatprep.subr.bf16.mxu1 %v3328_v37  ;;  %v3424_v36 = vld [vmem:[#allocation5 + $0x30c] ss:$16 sps:$4 sm:$0xff]   ;;  %v3419_v37 = vld [vmem:[#allocation5 + $0x300] ss:$16 sps:$4 sm:$0xff]  }
  0x95   :  { %1551 = vmatpush1.bf16.msra.mxu0 %v3330_v38  ;;  %1723 = vmatpush1.bf16.msra.mxu1 %v3331_v39  ;;  %v3422_v38 = vld [vmem:[#allocation5 + $0x308] ss:$16 sps:$4 sm:$0xff]   ;;  %v3427_v39 = vld [vmem:[#allocation5 + $0x324] ss:$16 sps:$4 sm:$0xff]  }
  0x96   :  { %1552 = vmatprep.subr.bf16.mxu0 %v3332_v40  ;;  %1724 = vmatprep.subr.bf16.mxu1 %v3334_v41  ;;  %v3430_v40 = vld [vmem:[#allocation5 + $0x32c] ss:$16 sps:$4 sm:$0xff]   ;;  %v3425_v41 = vld [vmem:[#allocation5 + $0x320] ss:$16 sps:$4 sm:$0xff]  }
  0x99   :  { %1553 = vmatpush1.bf16.msra.mxu0 %v3336_v42  ;;  %1725 = vmatpush1.bf16.msra.mxu1 %v3337_v43  ;;  %v3428_v42 = vld [vmem:[#allocation5 + $0x328] ss:$16 sps:$4 sm:$0xff]   ;;  %v3433_v43 = vld [vmem:[#allocation5 + $0x344] ss:$16 sps:$4 sm:$0xff]  }
  0x9a   :  { %1554 = vmatprep.subr.bf16.mxu0 %v3338_v44  ;;  %1726 = vmatprep.subr.bf16.mxu1 %v3340_v45  ;;  %v3436_v44 = vld [vmem:[#allocation5 + $0x34c] ss:$16 sps:$4 sm:$0xff]   ;;  %v3431_v45 = vld [vmem:[#allocation5 + $0x340] ss:$16 sps:$4 sm:$0xff]  }
  0x9d   :  { %1555 = vmatpush1.bf16.msra.mxu0 %v3342_v46  ;;  %1727 = vmatpush1.bf16.msra.mxu1 %v3343_v47  ;;  %v3434_v46 = vld [vmem:[#allocation5 + $0x348] ss:$16 sps:$4 sm:$0xff]   ;;  %v3439_v47 = vld [vmem:[#allocation5 + $0x364] ss:$16 sps:$4 sm:$0xff]  }
  0x9e   :  { %1556 = vmatprep.subr.bf16.mxu0 %v3344_v49  ;;  %1728 = vmatprep.subr.bf16.mxu1 %v3346_v50  ;;  %v3437_v49 = vld [vmem:[#allocation5 + $0x360] ss:$16 sps:$4 sm:$0xff]   ;;  %v3440_v50 = vld [vmem:[#allocation5 + $0x368] ss:$16 sps:$4 sm:$0xff]  }
  0xa1   :  { %1557 = vmatpush1.bf16.msra.mxu0 %v3348_v51  ;;  %1729 = vmatpush1.bf16.msra.mxu1 %v3349_v52  ;;  %v3445_v51 = vld [vmem:[#allocation5 + $0x384] ss:$16 sps:$4 sm:$0xff]   ;;  %v3448_v52 = vld [vmem:[#allocation5 + $0x38c] ss:$16 sps:$4 sm:$0xff]  }
  0xa2   :  { %1558 = vmatprep.subr.bf16.mxu0 %v3350_v53  ;;  %1730 = vmatprep.subr.bf16.mxu1 %v3352_v54  ;;  %v3443_v53 = vld [vmem:[#allocation5 + $0x380] ss:$16 sps:$4 sm:$0xff]   ;;  %v3446_v54 = vld [vmem:[#allocation5 + $0x388] ss:$16 sps:$4 sm:$0xff]  }
  0xa5   :  { %1559 = vmatpush1.bf16.msra.mxu0 %v3354_v55  ;;  %1731 = vmatpush1.bf16.msra.mxu1 %v3355_v56  ;;  %v3451_v55 = vld [vmem:[#allocation5 + $0x3a4] ss:$16 sps:$4 sm:$0xff]   ;;  %v3454_v56 = vld [vmem:[#allocation5 + $0x3ac] ss:$16 sps:$4 sm:$0xff]  }
  0xa6   :  { %1560 = vmatprep.subr.bf16.mxu0 %v3356_v57  ;;  %1732 = vmatprep.subr.bf16.mxu1 %v3358_v58  ;;  %v3449_v57 = vld [vmem:[#allocation5 + $0x3a0] ss:$16 sps:$4 sm:$0xff]   ;;  %v3452_v58 = vld [vmem:[#allocation5 + $0x3a8] ss:$16 sps:$4 sm:$0xff]  }
  0xa9   :  { %1561 = vmatpush1.bf16.msra.mxu0 %v3360_v59  ;;  %1733 = vmatpush1.bf16.msra.mxu1 %v3361_v60  ;;  %v3457_v59 = vld [vmem:[#allocation5 + $0x3c4] ss:$16 sps:$4 sm:$0xff]   ;;  %v3460_v60 = vld [vmem:[#allocation5 + $0x3cc] ss:$16 sps:$4 sm:$0xff]  }
  0xaa   :  { %1562 = vmatprep.subr.bf16.mxu0 %v3362_v61  ;;  %1734 = vmatprep.subr.bf16.mxu1 %v3364_v62  ;;  %v3455_v61 = vld [vmem:[#allocation5 + $0x3c0] ss:$16 sps:$4 sm:$0xff]   ;;  %v3458_v62 = vld [vmem:[#allocation5 + $0x3c8] ss:$16 sps:$4 sm:$0xff]  }
  0xad   :  { %1563 = vmatpush1.bf16.msra.mxu0 %v3366_v63  ;;  %1735 = vmatpush1.bf16.msra.mxu1 %v3367_v0  ;;  %v3463_v63 = vld [vmem:[#allocation5 + $0x3e4] ss:$16 sps:$4 sm:$0xff]   ;;  %v3466_v0 = vld [vmem:[#allocation5 + $0x3ec] ss:$16 sps:$4 sm:$0xff]  }
  0xae   :  { %1575 = vmatprep.subr.bf16.mxu0 %v3373_v1  ;;  %1747 = vmatprep.subr.bf16.mxu1 %v3376_v2  ;;  %v3461_v1 = vld [vmem:[#allocation5 + $0x3e0] ss:$16 sps:$4 sm:$0xff]   ;;  %v3464_v2 = vld [vmem:[#allocation5 + $0x3e8] ss:$16 sps:$4 sm:$0xff]  }
  0xb0   :  { %1565 = vmatmul.mubr.bf16.vlgmr.msra.gmra.mrb[0].mxu0 %v3368_v3  ;;  %1737 = vmatmul.mubr.bf16.vlgmr.msra.gmra.mrb[0].mxu1 %v3368_v3  ;;  %v3472_v3 = vld [vmem:[#allocation5 + $0x404] ss:$16 sps:$4 sm:$0xff]  }
  0xb1   :  { %1576 = vmatpush1.bf16.msra.mxu0 %v3371_v4  ;;  %1748 = vmatpush1.bf16.msra.mxu1 %v3374_v5  ;;  %v3475_v4 = vld [vmem:[#allocation5 + $0x40c] ss:$16 sps:$4 sm:$0xff]  }
  0xb2   :  { %1577 = vmatprep.subr.bf16.mxu0 %v3379_v6  ;;  %1749 = vmatprep.subr.bf16.mxu1 %v3382_v7  ;;  %v3467_v5 = vld [vmem:[#allocation2 + $0x8] ss:$28 sps:$4 sm:$0xff]   ;;  %v3473_v7 = vld [vmem:[#allocation5 + $0x408] ss:$16 sps:$4 sm:$0xff]  }
  0xb3   :  { %1607 = vmatprep.mubr.bf16.mxu0 %v3469_v30  ;;  %1779 = vmatprep.mubr.bf16.mxu1 %v3469_v30  ;;  %v3470_v6 = vld [vmem:[#allocation5 + $0x400] ss:$16 sps:$4 sm:$0xff]   ;;  %v3511_v30 = vld [vmem:[#allocation5 + $0x4cc] ss:$16 sps:$4 sm:$0xff]  }
  0xb5   :  { %1578 = vmatpush1.bf16.msra.mxu0 %v3377_v8  ;;  %1750 = vmatpush1.bf16.msra.mxu1 %v3380_v9  ;;  %v3478_v8 = vld [vmem:[#allocation5 + $0x424] ss:$16 sps:$4 sm:$0xff]   ;;  %v3481_v9 = vld [vmem:[#allocation5 + $0x42c] ss:$16 sps:$4 sm:$0xff]  }
  0xb6   :  { %1579 = vmatprep.subr.bf16.mxu0 %v3385_v10  ;;  %1751 = vmatprep.subr.bf16.mxu1 %v3388_v11  ;;  %v3476_v10 = vld [vmem:[#allocation5 + $0x420] ss:$16 sps:$4 sm:$0xff]   ;;  %v3479_v11 = vld [vmem:[#allocation5 + $0x428] ss:$16 sps:$4 sm:$0xff]  }
  0xb9   :  { %1580 = vmatpush1.bf16.msra.mxu0 %v3383_v12  ;;  %1752 = vmatpush1.bf16.msra.mxu1 %v3386_v13  ;;  %v3568_v12 = vld [vmem:[#allocation2 + $0x14] ss:$28 sps:$4 sm:$0xff]   ;;  %v3484_v13 = vld [vmem:[#allocation5 + $0x444] ss:$16 sps:$4 sm:$0xff]  }
  0xba   :  { %1581 = vmatprep.subr.bf16.mxu0 %v3391_v14  ;;  %1753 = vmatprep.subr.bf16.mxu1 %v3394_v15  ;;  %v3487_v14 = vld [vmem:[#allocation5 + $0x44c] ss:$16 sps:$4 sm:$0xff]   ;;  %v3482_v15 = vld [vmem:[#allocation5 + $0x440] ss:$16 sps:$4 sm:$0xff]  }
  0xbd   :  { %1582 = vmatpush1.bf16.msra.mxu0 %v3389_v16  ;;  %1754 = vmatpush1.bf16.msra.mxu1 %v3392_v17  ;;  %v3485_v16 = vld [vmem:[#allocation5 + $0x448] ss:$16 sps:$4 sm:$0xff]   ;;  %v3490_v17 = vld [vmem:[#allocation5 + $0x464] ss:$16 sps:$4 sm:$0xff]  }
  0xbe   :  { %1583 = vmatprep.subr.bf16.mxu0 %v3397_v18  ;;  %1755 = vmatprep.subr.bf16.mxu1 %v3400_v19  ;;  %v3493_v18 = vld [vmem:[#allocation5 + $0x46c] ss:$16 sps:$4 sm:$0xff]   ;;  %v3488_v19 = vld [vmem:[#allocation5 + $0x460] ss:$16 sps:$4 sm:$0xff]  }
  0xc1   :  { %1584 = vmatpush1.bf16.msra.mxu0 %v3395_v20  ;;  %1756 = vmatpush1.bf16.msra.mxu1 %v3398_v21  ;;  %v3491_v20 = vld [vmem:[#allocation5 + $0x468] ss:$16 sps:$4 sm:$0xff]   ;;  %v3496_v21 = vld [vmem:[#allocation5 + $0x484] ss:$16 sps:$4 sm:$0xff]  }
  0xc2   :  { %1585 = vmatprep.subr.bf16.mxu0 %v3403_v22  ;;  %1757 = vmatprep.subr.bf16.mxu1 %v3406_v23  ;;  %v3499_v22 = vld [vmem:[#allocation5 + $0x48c] ss:$16 sps:$4 sm:$0xff]   ;;  %v3494_v23 = vld [vmem:[#allocation5 + $0x480] ss:$16 sps:$4 sm:$0xff]  }
  0xc5   :  { %1586 = vmatpush1.bf16.msra.mxu0 %v3401_v24  ;;  %1758 = vmatpush1.bf16.msra.mxu1 %v3404_v25  ;;  %v3497_v24 = vld [vmem:[#allocation5 + $0x488] ss:$16 sps:$4 sm:$0xff]   ;;  %v3502_v25 = vld [vmem:[#allocation5 + $0x4a4] ss:$16 sps:$4 sm:$0xff]  }
  0xc6   :  { %1587 = vmatprep.subr.bf16.mxu0 %v3409_v26  ;;  %1759 = vmatprep.subr.bf16.mxu1 %v3412_v27  ;;  %v3505_v26 = vld [vmem:[#allocation5 + $0x4ac] ss:$16 sps:$4 sm:$0xff]   ;;  %v3500_v27 = vld [vmem:[#allocation5 + $0x4a0] ss:$16 sps:$4 sm:$0xff]  }
  0xc9   :  { %1588 = vmatpush1.bf16.msra.mxu0 %v3407_v28  ;;  %1760 = vmatpush1.bf16.msra.mxu1 %v3410_v29  ;;  %v3503_v28 = vld [vmem:[#allocation5 + $0x4a8] ss:$16 sps:$4 sm:$0xff]   ;;  %v3508_v29 = vld [vmem:[#allocation5 + $0x4c4] ss:$16 sps:$4 sm:$0xff]  }
  0xca   :  { %1589 = vmatprep.subr.bf16.mxu0 %v3415_v31  ;;  %1761 = vmatprep.subr.bf16.mxu1 %v3418_v32  ;;  %v3506_v31 = vld [vmem:[#allocation5 + $0x4c0] ss:$16 sps:$4 sm:$0xff]   ;;  %v3509_v32 = vld [vmem:[#allocation5 + $0x4c8] ss:$16 sps:$4 sm:$0xff]  }
  0xcd   :  { %1590 = vmatpush1.bf16.msra.mxu0 %v3413_v33  ;;  %1762 = vmatpush1.bf16.msra.mxu1 %v3416_v34  ;;  %v3514_v33 = vld [vmem:[#allocation5 + $0x4e4] ss:$16 sps:$4 sm:$0xff]   ;;  %v3517_v34 = vld [vmem:[#allocation5 + $0x4ec] ss:$16 sps:$4 sm:$0xff]  }
  0xce   :  { %1591 = vmatprep.subr.bf16.mxu0 %v3421_v35  ;;  %1763 = vmatprep.subr.bf16.mxu1 %v3424_v36  ;;  %v3512_v35 = vld [vmem:[#allocation5 + $0x4e0] ss:$16 sps:$4 sm:$0xff]   ;;  %v3515_v36 = vld [vmem:[#allocation5 + $0x4e8] ss:$16 sps:$4 sm:$0xff]  }
  0xd1   :  { %1592 = vmatpush1.bf16.msra.mxu0 %v3419_v37  ;;  %1764 = vmatpush1.bf16.msra.mxu1 %v3422_v38  ;;  %v3520_v37 = vld [vmem:[#allocation5 + $0x504] ss:$16 sps:$4 sm:$0xff]   ;;  %v3523_v38 = vld [vmem:[#allocation5 + $0x50c] ss:$16 sps:$4 sm:$0xff]  }
  0xd2   :  { %1593 = vmatprep.subr.bf16.mxu0 %v3427_v39  ;;  %1765 = vmatprep.subr.bf16.mxu1 %v3430_v40  ;;  %v3518_v39 = vld [vmem:[#allocation5 + $0x500] ss:$16 sps:$4 sm:$0xff]   ;;  %v3521_v40 = vld [vmem:[#allocation5 + $0x508] ss:$16 sps:$4 sm:$0xff]  }
  0xd5   :  { %1594 = vmatpush1.bf16.msra.mxu0 %v3425_v41  ;;  %1766 = vmatpush1.bf16.msra.mxu1 %v3428_v42  ;;  %v3526_v41 = vld [vmem:[#allocation5 + $0x524] ss:$16 sps:$4 sm:$0xff]   ;;  %v3529_v42 = vld [vmem:[#allocation5 + $0x52c] ss:$16 sps:$4 sm:$0xff]  }
  0xd6   :  { %1595 = vmatprep.subr.bf16.mxu0 %v3433_v43  ;;  %1767 = vmatprep.subr.bf16.mxu1 %v3436_v44  ;;  %v3524_v43 = vld [vmem:[#allocation5 + $0x520] ss:$16 sps:$4 sm:$0xff]   ;;  %v3527_v44 = vld [vmem:[#allocation5 + $0x528] ss:$16 sps:$4 sm:$0xff]  }
  0xd9   :  { %1596 = vmatpush1.bf16.msra.mxu0 %v3431_v45  ;;  %1768 = vmatpush1.bf16.msra.mxu1 %v3434_v46  ;;  %v3532_v45 = vld [vmem:[#allocation5 + $0x544] ss:$16 sps:$4 sm:$0xff]   ;;  %v3535_v46 = vld [vmem:[#allocation5 + $0x54c] ss:$16 sps:$4 sm:$0xff]  }
  0xda   :  { %1597 = vmatprep.subr.bf16.mxu0 %v3439_v47  ;;  %1769 = vmatprep.subr.bf16.mxu1 %v3442_v48  ;;  %v3530_v47 = vld [vmem:[#allocation5 + $0x540] ss:$16 sps:$4 sm:$0xff]   ;;  %v3533_v48 = vld [vmem:[#allocation5 + $0x548] ss:$16 sps:$4 sm:$0xff]  }
  0xdd   :  { %1598 = vmatpush1.bf16.msra.mxu0 %v3437_v49  ;;  %1770 = vmatpush1.bf16.msra.mxu1 %v3440_v50  ;;  %v3538_v49 = vld [vmem:[#allocation5 + $0x564] ss:$16 sps:$4 sm:$0xff]   ;;  %v3541_v50 = vld [vmem:[#allocation5 + $0x56c] ss:$16 sps:$4 sm:$0xff]  }
  0xde   :  { %1599 = vmatprep.subr.bf16.mxu0 %v3445_v51  ;;  %1771 = vmatprep.subr.bf16.mxu1 %v3448_v52  ;;  %v3536_v51 = vld [vmem:[#allocation5 + $0x560] ss:$16 sps:$4 sm:$0xff]   ;;  %v3539_v52 = vld [vmem:[#allocation5 + $0x568] ss:$16 sps:$4 sm:$0xff]  }
  0xe1   :  { %1600 = vmatpush1.bf16.msra.mxu0 %v3443_v53  ;;  %1772 = vmatpush1.bf16.msra.mxu1 %v3446_v54  ;;  %v3544_v53 = vld [vmem:[#allocation5 + $0x584] ss:$16 sps:$4 sm:$0xff]   ;;  %v3547_v54 = vld [vmem:[#allocation5 + $0x58c] ss:$16 sps:$4 sm:$0xff]  }
  0xe2   :  { %1601 = vmatprep.subr.bf16.mxu0 %v3451_v55  ;;  %1773 = vmatprep.subr.bf16.mxu1 %v3454_v56  ;;  %v3542_v55 = vld [vmem:[#allocation5 + $0x580] ss:$16 sps:$4 sm:$0xff]   ;;  %v3545_v56 = vld [vmem:[#allocation5 + $0x588] ss:$16 sps:$4 sm:$0xff]  }
  0xe5   :  { %1602 = vmatpush1.bf16.msra.mxu0 %v3449_v57  ;;  %1774 = vmatpush1.bf16.msra.mxu1 %v3452_v58  ;;  %v3550_v57 = vld [vmem:[#allocation5 + $0x5a4] ss:$16 sps:$4 sm:$0xff]   ;;  %v3553_v58 = vld [vmem:[#allocation5 + $0x5ac] ss:$16 sps:$4 sm:$0xff]  }
  0xe6   :  { %1603 = vmatprep.subr.bf16.mxu0 %v3457_v59  ;;  %1775 = vmatprep.subr.bf16.mxu1 %v3460_v60  ;;  %v3548_v59 = vld [vmem:[#allocation5 + $0x5a0] ss:$16 sps:$4 sm:$0xff]   ;;  %v3551_v60 = vld [vmem:[#allocation5 + $0x5a8] ss:$16 sps:$4 sm:$0xff]  }
  0xe9   :  { %1604 = vmatpush1.bf16.msra.mxu0 %v3455_v61  ;;  %1776 = vmatpush1.bf16.msra.mxu1 %v3458_v62  ;;  %v3556_v61 = vld [vmem:[#allocation5 + $0x5c4] ss:$16 sps:$4 sm:$0xff]   ;;  %v3559_v62 = vld [vmem:[#allocation5 + $0x5cc] ss:$16 sps:$4 sm:$0xff]  }
  0xea   :  { %1605 = vmatprep.subr.bf16.mxu0 %v3463_v63  ;;  %1777 = vmatprep.subr.bf16.mxu1 %v3466_v0  ;;  %v3554_v63 = vld [vmem:[#allocation5 + $0x5c0] ss:$16 sps:$4 sm:$0xff]   ;;  %v3557_v0 = vld [vmem:[#allocation5 + $0x5c8] ss:$16 sps:$4 sm:$0xff]  }
  0xed   :  { %1606 = vmatpush1.bf16.msra.mxu0 %v3461_v1  ;;  %1778 = vmatpush1.bf16.msra.mxu1 %v3464_v2  ;;  %v3562_v1 = vld [vmem:[#allocation5 + $0x5e4] ss:$16 sps:$4 sm:$0xff]   ;;  %v3565_v2 = vld [vmem:[#allocation5 + $0x5ec] ss:$16 sps:$4 sm:$0xff]  }
  0xee   :  { %1618 = vmatprep.subr.bf16.mxu0 %v3472_v3  ;;  %1790 = vmatprep.subr.bf16.mxu1 %v3475_v4  ;;  %v3560_v3 = vld [vmem:[#allocation5 + $0x5e0] ss:$16 sps:$4 sm:$0xff]   ;;  %v3563_v4 = vld [vmem:[#allocation5 + $0x5e8] ss:$16 sps:$4 sm:$0xff]  }
  0xf0   :  { %1608 = vmatmul.mubr.bf16.vlgmr.msra.gmra.mrb[0].mxu0 %v3467_v5  ;;  %1780 = vmatmul.mubr.bf16.vlgmr.msra.gmra.mrb[0].mxu1 %v3467_v5  ;;  %v3571_v5 = vld [vmem:[#allocation5 + $0x604] ss:$16 sps:$4 sm:$0xff]  }
  0xf1   :  { %1619 = vmatpush1.bf16.msra.mxu0 %v3470_v6  ;;  %1791 = vmatpush1.bf16.msra.mxu1 %v3473_v7  ;;  %v3574_v6 = vld [vmem:[#allocation5 + $0x60c] ss:$16 sps:$4 sm:$0xff]   ;;  %v3566_v7 = vld [vmem:[#allocation2 + $0x10] ss:$28 sps:$4 sm:$0xff]  }
  0xf2   :  { %1620 = vmatprep.subr.bf16.mxu0 %v3478_v8  ;;  %1792 = vmatprep.subr.bf16.mxu1 %v3481_v9  ;;  %v3569_v8 = vld [vmem:[#allocation5 + $0x600] ss:$16 sps:$4 sm:$0xff]   ;;  %v3572_v9 = vld [vmem:[#allocation5 + $0x608] ss:$16 sps:$4 sm:$0xff]  }
  0xf3   :  { %1650 = vmatprep.mubr.bf16.mxu0 %v3568_v12  ;;  %1822 = vmatprep.mubr.bf16.mxu1 %v3568_v12  ;;  %v3575_v12 = vld [vmem:[#allocation5 + $0x620] ss:$16 sps:$4 sm:$0xff]  }
  0xf5   :  { %1621 = vmatpush1.bf16.msra.mxu0 %v3476_v10  ;;  %1793 = vmatpush1.bf16.msra.mxu1 %v3479_v11  ;;  %v3577_v10 = vld [vmem:[#allocation5 + $0x624] ss:$16 sps:$4 sm:$0xff]   ;;  %v3580_v11 = vld [vmem:[#allocation5 + $0x62c] ss:$16 sps:$4 sm:$0xff]  }
  0xf6   :  { %1622 = vmatprep.subr.bf16.mxu0 %v3484_v13  ;;  %1794 = vmatprep.subr.bf16.mxu1 %v3487_v14  ;;  %v3578_v13 = vld [vmem:[#allocation5 + $0x628] ss:$16 sps:$4 sm:$0xff]   ;;  %v3583_v14 = vld [vmem:[#allocation5 + $0x644] ss:$16 sps:$4 sm:$0xff]  }
  0xf9   :  { %1623 = vmatpush1.bf16.msra.mxu0 %v3482_v15  ;;  %1795 = vmatpush1.bf16.msra.mxu1 %v3485_v16  ;;  %v3586_v15 = vld [vmem:[#allocation5 + $0x64c] ss:$16 sps:$4 sm:$0xff]   ;;  %v3581_v16 = vld [vmem:[#allocation5 + $0x640] ss:$16 sps:$4 sm:$0xff]  }
  0xfa   :  { %1624 = vmatprep.subr.bf16.mxu0 %v3490_v17  ;;  %1796 = vmatprep.subr.bf16.mxu1 %v3493_v18  ;;  %v3584_v17 = vld [vmem:[#allocation5 + $0x648] ss:$16 sps:$4 sm:$0xff]   ;;  %v3924_v18 = vmov 0  }
  0xfd   :  { %1625 = vmatpush1.bf16.msra.mxu0 %v3488_v19  ;;  %1797 = vmatpush1.bf16.msra.mxu1 %v3491_v20  ;;  %v3589_v19 = vld [vmem:[#allocation5 + $0x664] ss:$16 sps:$4 sm:$0xff]   ;;  %v3592_v20 = vld [vmem:[#allocation5 + $0x66c] ss:$16 sps:$4 sm:$0xff]  }
  0xfe   :  { %1626 = vmatprep.subr.bf16.mxu0 %v3496_v21  ;;  %1798 = vmatprep.subr.bf16.mxu1 %v3499_v22  ;;  %v3587_v21 = vld [vmem:[#allocation5 + $0x660] ss:$16 sps:$4 sm:$0xff]   ;;  %v3590_v22 = vld [vmem:[#allocation5 + $0x668] ss:$16 sps:$4 sm:$0xff]  }
 0x101   :  { %1627 = vmatpush1.bf16.msra.mxu0 %v3494_v23  ;;  %1799 = vmatpush1.bf16.msra.mxu1 %v3497_v24  ;;  %v3595_v23 = vld [vmem:[#allocation5 + $0x684] ss:$16 sps:$4 sm:$0xff]   ;;  %v3598_v24 = vld [vmem:[#allocation5 + $0x68c] ss:$16 sps:$4 sm:$0xff]  }
 0x102   :  { %1628 = vmatprep.subr.bf16.mxu0 %v3502_v25  ;;  %1800 = vmatprep.subr.bf16.mxu1 %v3505_v26  ;;  %v3593_v25 = vld [vmem:[#allocation5 + $0x680] ss:$16 sps:$4 sm:$0xff]   ;;  %v3596_v26 = vld [vmem:[#allocation5 + $0x688] ss:$16 sps:$4 sm:$0xff]  }
 0x105   :  { %1629 = vmatpush1.bf16.msra.mxu0 %v3500_v27  ;;  %1801 = vmatpush1.bf16.msra.mxu1 %v3503_v28  ;;  %v3601_v27 = vld [vmem:[#allocation5 + $0x6a4] ss:$16 sps:$4 sm:$0xff]   ;;  %v3604_v28 = vld [vmem:[#allocation5 + $0x6ac] ss:$16 sps:$4 sm:$0xff]  }
 0x106   :  { %1630 = vmatprep.subr.bf16.mxu0 %v3508_v29  ;;  %1802 = vmatprep.subr.bf16.mxu1 %v3511_v30  ;;  %v3599_v29 = vld [vmem:[#allocation5 + $0x6a0] ss:$16 sps:$4 sm:$0xff]   ;;  %v3602_v30 = vld [vmem:[#allocation5 + $0x6a8] ss:$16 sps:$4 sm:$0xff]  }
 0x109   :  { %1631 = vmatpush1.bf16.msra.mxu0 %v3506_v31  ;;  %1803 = vmatpush1.bf16.msra.mxu1 %v3509_v32  ;;  %v3607_v31 = vld [vmem:[#allocation5 + $0x6c4] ss:$16 sps:$4 sm:$0xff]   ;;  %v3610_v32 = vld [vmem:[#allocation5 + $0x6cc] ss:$16 sps:$4 sm:$0xff]  }
 0x10a   :  { %1632 = vmatprep.subr.bf16.mxu0 %v3514_v33  ;;  %1804 = vmatprep.subr.bf16.mxu1 %v3517_v34  ;;  %v3605_v33 = vld [vmem:[#allocation5 + $0x6c0] ss:$16 sps:$4 sm:$0xff]   ;;  %v3608_v34 = vld [vmem:[#allocation5 + $0x6c8] ss:$16 sps:$4 sm:$0xff]  }
 0x10d   :  { %1633 = vmatpush1.bf16.msra.mxu0 %v3512_v35  ;;  %1805 = vmatpush1.bf16.msra.mxu1 %v3515_v36  ;;  %v3613_v35 = vld [vmem:[#allocation5 + $0x6e4] ss:$16 sps:$4 sm:$0xff]   ;;  %v3616_v36 = vld [vmem:[#allocation5 + $0x6ec] ss:$16 sps:$4 sm:$0xff]  }
 0x10e   :  { %1634 = vmatprep.subr.bf16.mxu0 %v3520_v37  ;;  %1806 = vmatprep.subr.bf16.mxu1 %v3523_v38  ;;  %v3611_v37 = vld [vmem:[#allocation5 + $0x6e0] ss:$16 sps:$4 sm:$0xff]   ;;  %v3614_v38 = vld [vmem:[#allocation5 + $0x6e8] ss:$16 sps:$4 sm:$0xff]  }
 0x111   :  { %1635 = vmatpush1.bf16.msra.mxu0 %v3518_v39  ;;  %1807 = vmatpush1.bf16.msra.mxu1 %v3521_v40  ;;  %v3620_v39 = vld [vmem:[#allocation7 + $0x4] ss:$8 sps:$4 sm:$0xff]   ;;  %v3617_v40 = vld [vmem:[#allocation2 + $0x18] ss:$28 sps:$4 sm:$0xff]  }
 0x112   :  { %1636 = vmatprep.subr.bf16.mxu0 %v3526_v41  ;;  %1808 = vmatprep.subr.bf16.mxu1 %v3529_v42  ;;  %v3618_v41 = vld [vmem:[#allocation7] ss:$8 sps:$4 sm:$0xff]   ;;  %v3623_v42 = vld [vmem:[#allocation7 + $0x14] ss:$8 sps:$4 sm:$0xff]  }
 0x115   :  { %1637 = vmatpush1.bf16.msra.mxu0 %v3524_v43  ;;  %1809 = vmatpush1.bf16.msra.mxu1 %v3527_v44  ;;  %v3621_v43 = vld [vmem:[#allocation7 + $0x10] ss:$8 sps:$4 sm:$0xff]   ;;  %v3626_v44 = vld [vmem:[#allocation7 + $0x24] ss:$8 sps:$4 sm:$0xff]  }
 0x116   :  { %1638 = vmatprep.subr.bf16.mxu0 %v3532_v45  ;;  %1810 = vmatprep.subr.bf16.mxu1 %v3535_v46  ;;  %v3624_v45 = vld [vmem:[#allocation7 + $0x20] ss:$8 sps:$4 sm:$0xff]   ;;  %v3629_v46 = vld [vmem:[#allocation7 + $0x34] ss:$8 sps:$4 sm:$0xff]  }
 0x119   :  { %1639 = vmatpush1.bf16.msra.mxu0 %v3530_v47  ;;  %1811 = vmatpush1.bf16.msra.mxu1 %v3533_v48  ;;  %v3627_v47 = vld [vmem:[#allocation7 + $0x30] ss:$8 sps:$4 sm:$0xff]   ;;  %v3632_v48 = vld [vmem:[#allocation7 + $0x44] ss:$8 sps:$4 sm:$0xff]  }
 0x11a   :  { %1640 = vmatprep.subr.bf16.mxu0 %v3538_v49  ;;  %1812 = vmatprep.subr.bf16.mxu1 %v3541_v50  ;;  %v3630_v49 = vld [vmem:[#allocation7 + $0x40] ss:$8 sps:$4 sm:$0xff]   ;;  %v3635_v50 = vld [vmem:[#allocation7 + $0x54] ss:$8 sps:$4 sm:$0xff]  }
 0x11d   :  { %1641 = vmatpush1.bf16.msra.mxu0 %v3536_v51  ;;  %1813 = vmatpush1.bf16.msra.mxu1 %v3539_v52  ;;  %v3633_v51 = vld [vmem:[#allocation7 + $0x50] ss:$8 sps:$4 sm:$0xff]   ;;  %v3638_v52 = vld [vmem:[#allocation7 + $0x64] ss:$8 sps:$4 sm:$0xff]  }
 0x11e   :  { %1642 = vmatprep.subr.bf16.mxu0 %v3544_v53  ;;  %1814 = vmatprep.subr.bf16.mxu1 %v3547_v54  ;;  %v3636_v53 = vld [vmem:[#allocation7 + $0x60] ss:$8 sps:$4 sm:$0xff]   ;;  %v3641_v54 = vld [vmem:[#allocation7 + $0x74] ss:$8 sps:$4 sm:$0xff]  }
 0x121   :  { %1643 = vmatpush1.bf16.msra.mxu0 %v3542_v55  ;;  %1815 = vmatpush1.bf16.msra.mxu1 %v3545_v56  ;;  %v3639_v55 = vld [vmem:[#allocation7 + $0x70] ss:$8 sps:$4 sm:$0xff]   ;;  %v3644_v56 = vld [vmem:[#allocation7 + $0x84] ss:$8 sps:$4 sm:$0xff]  }
 0x122   :  { %1644 = vmatprep.subr.bf16.mxu0 %v3550_v57  ;;  %1816 = vmatprep.subr.bf16.mxu1 %v3553_v58  ;;  %v3642_v57 = vld [vmem:[#allocation7 + $0x80] ss:$8 sps:$4 sm:$0xff]   ;;  %v3647_v58 = vld [vmem:[#allocation7 + $0x94] ss:$8 sps:$4 sm:$0xff]  }
 0x125   :  { %1645 = vmatpush1.bf16.msra.mxu0 %v3548_v59  ;;  %1817 = vmatpush1.bf16.msra.mxu1 %v3551_v60  ;;  %v3645_v59 = vld [vmem:[#allocation7 + $0x90] ss:$8 sps:$4 sm:$0xff]   ;;  %v3650_v60 = vld [vmem:[#allocation7 + $0xa4] ss:$8 sps:$4 sm:$0xff]  }
 0x126   :  { %1646 = vmatprep.subr.bf16.mxu0 %v3556_v61  ;;  %1818 = vmatprep.subr.bf16.mxu1 %v3559_v62  ;;  %v3648_v61 = vld [vmem:[#allocation7 + $0xa0] ss:$8 sps:$4 sm:$0xff]   ;;  %v3653_v62 = vld [vmem:[#allocation7 + $0xb4] ss:$8 sps:$4 sm:$0xff]  }
 0x129   :  { %1647 = vmatpush1.bf16.msra.mxu0 %v3554_v63  ;;  %1819 = vmatpush1.bf16.msra.mxu1 %v3557_v0  ;;  %v3651_v63 = vld [vmem:[#allocation7 + $0xb0] ss:$8 sps:$4 sm:$0xff]   ;;  %v3656_v0 = vld [vmem:[#allocation7 + $0xc4] ss:$8 sps:$4 sm:$0xff]  }
 0x12a   :  { %1648 = vmatprep.subr.bf16.mxu0 %v3562_v1  ;;  %1820 = vmatprep.subr.bf16.mxu1 %v3565_v2  ;;  %v3654_v1 = vld [vmem:[#allocation7 + $0xc0] ss:$8 sps:$4 sm:$0xff]   ;;  %v3659_v2 = vld [vmem:[#allocation7 + $0xd4] ss:$8 sps:$4 sm:$0xff]  }
 0x12d   :  { %1649 = vmatpush1.bf16.msra.mxu0 %v3560_v3  ;;  %1821 = vmatpush1.bf16.msra.mxu1 %v3563_v4  ;;  %v3657_v3 = vld [vmem:[#allocation7 + $0xd0] ss:$8 sps:$4 sm:$0xff]   ;;  %v3662_v4 = vld [vmem:[#allocation7 + $0xe4] ss:$8 sps:$4 sm:$0xff]  }
 0x12e   :  { %1661 = vmatprep.subr.bf16.mxu0 %v3571_v5  ;;  %1833 = vmatprep.subr.bf16.mxu1 %v3574_v6  ;;  %v3660_v5 = vld [vmem:[#allocation7 + $0xe0] ss:$8 sps:$4 sm:$0xff]   ;;  %v3665_v6 = vld [vmem:[#allocation7 + $0xf4] ss:$8 sps:$4 sm:$0xff]  }
 0x130   :  { %1651 = vmatmul.mubr.bf16.vlgmr.msra.gmra.mrb[0].mxu0 %v3566_v7  ;;  %1823 = vmatmul.mubr.bf16.vlgmr.msra.gmra.mrb[0].mxu1 %v3566_v7  ;;  %v3663_v7 = vld [vmem:[#allocation7 + $0xf0] ss:$8 sps:$4 sm:$0xff]  }
 0x131   :  { %1662 = vmatpush1.bf16.msra.mxu0 %v3569_v8  ;;  %1834 = vmatpush1.bf16.msra.mxu1 %v3572_v9  ;;  %v3668_v8 = vld [vmem:[#allocation7 + $0x104] ss:$8 sps:$4 sm:$0xff]  }
 0x132   :  { %1663 = vmatprep.subr.bf16.mxu0 %v3577_v10  ;;  %1835 = vmatprep.subr.bf16.mxu1 %v3580_v11  ;;  %v3714_v9 = vld [vmem:[#allocation8 + $0x40] sm:$0xff]   ;;  %v3716_v11 = vld [vmem:[#allocation8 + $0x48] sm:$0xff]  }
 0x133   :  { %1693 = vmatprep.mubr.bf16.mxu0 %v3924_v18  ;;  %1865 = vmatprep.mubr.bf16.mxu1 %v3924_v18  ;;  %v3715_v10 = vld [vmem:[#allocation8] sm:$0xff]  }
 0x134   :  { %v3723_v18 = vld [vmem:[#allocation8 + $0x20] sm:$0xff]  }
 0x135   :  { %1664 = vmatpush1.bf16.msra.mxu0 %v3575_v12  ;;  %1836 = vmatpush1.bf16.msra.mxu1 %v3578_v13  ;;  %v3717_v12 = vld [vmem:[#allocation8 + $0x8] sm:$0xff]   ;;  %v3718_v13 = vld [vmem:[#allocation8 + $0x50] sm:$0xff]  }
 0x136   :  { %1665 = vmatprep.subr.bf16.mxu0 %v3583_v14  ;;  %1837 = vmatprep.subr.bf16.mxu1 %v3586_v15  ;;  %v3719_v14 = vld [vmem:[#allocation8 + $0x10] sm:$0xff]   ;;  %v3720_v15 = vld [vmem:[#allocation8 + $0x58] sm:$0xff]  }
 0x139   :  { %1666 = vmatpush1.bf16.msra.mxu0 %v3581_v16  ;;  %1838 = vmatpush1.bf16.msra.mxu1 %v3584_v17  ;;  %v3721_v16 = vld [vmem:[#allocation8 + $0x18] sm:$0xff]   ;;  %v3722_v17 = vld [vmem:[#allocation8 + $0x60] sm:$0xff]  }
 0x13a   :  { %1667 = vmatprep.subr.bf16.mxu0 %v3589_v19  ;;  %1839 = vmatprep.subr.bf16.mxu1 %v3592_v20  ;;  %v3724_v19 = vld [vmem:[#allocation8 + $0x68] sm:$0xff]   ;;  %v356_v20 = vlaneseq }
 0x13d   :  { %1668 = vmatpush1.bf16.msra.mxu0 %v3587_v21  ;;  %1840 = vmatpush1.bf16.msra.mxu1 %v3590_v22  ;;  %v4079_v21 = vshrl.u32 %v356_v20, 7  ;;  %v3707_v20 = vld [vmem:[#allocation7 + $0x1d4] ss:$8 sps:$4 sm:$0xff]  }
 0x13e   :  { %1669 = vmatprep.subr.bf16.mxu0 %v3595_v23  ;;  %1841 = vmatprep.subr.bf16.mxu1 %v3598_v24  ;;  %v354_v24 = vld [vmem:[%s4148_s2] sm:$0xf] }
 0x13f   :  { %v358_v22 = vsub.s32 0, %v4079_v21  ;;  %v366_v23 = vsub.s32 2, %v4079_v21 }
 0x141   :  { %1670 = vmatpush1.bf16.msra.mxu0 %v3593_v25  ;;  %1842 = vmatpush1.bf16.msra.mxu1 %v3596_v26  ;;  %v362_v25 = vsub.s32 1, %v4079_v21  ;;  %v370_v26 = vsub.s32 3, %v4079_v21  ;;  %v3731_v21 = vld [vmem:[#allocation10 + $0x8] sm:$0xff]  }
 0x142   :  { %1671 = vmatprep.subr.bf16.mxu0 %v3601_v27  ;;  %1843 = vmatprep.subr.bf16.mxu1 %v3604_v28  ;;  %v359_v27 = vrot.slane %v354_v24, %v358_v22  ;;  %v367_v28 = vrot.slane %v354_v24, %v366_v23  ;;  %v3705_v23 = vld [vmem:[#allocation7 + $0x1d0] ss:$8 sps:$4 sm:$0xff]  }
 0x145   :  { %1672 = vmatpush1.bf16.msra.mxu0 %v3599_v29  ;;  %1844 = vmatpush1.bf16.msra.mxu1 %v3602_v30  ;;  %v363_v29 = vrot.slane %v354_v24, %v362_v25  ;;  %v371_v30 = vrot.slane %v354_v24, %v370_v26  ;;  %v3710_v24 = vld [vmem:[#allocation7 + $0x1e4] ss:$8 sps:$4 sm:$0xff]   ;;  %v3708_v26 = vld [vmem:[#allocation7 + $0x1e0] ss:$8 sps:$4 sm:$0xff]  }
 0x146   :  { %1673 = vmatprep.subr.bf16.mxu0 %v3607_v31  ;;  %1845 = vmatprep.subr.bf16.mxu1 %v3610_v32 }
 0x149   :  { %1674 = vmatpush1.bf16.msra.mxu0 %v3605_v33  ;;  %1846 = vmatpush1.bf16.msra.mxu1 %v3608_v34 }
 0x14a   :  { %1675 = vmatprep.subr.bf16.mxu0 %v3613_v35  ;;  %1847 = vmatprep.subr.bf16.mxu1 %v3616_v36 }
 0x14d   :  { %1676 = vmatpush1.bf16.msra.mxu0 %v3611_v37  ;;  %1848 = vmatpush1.bf16.msra.mxu1 %v3614_v38 }
 0x14e   :  { %2284 = vmatprep.subr.bf16.mxu0 %v3620_v39  ;;  %3134 = vmatprep.subr.bf16.mxu1 %v3714_v9  ;;  %v3687_v9 = vld [vmem:[#allocation7 + $0x170] ss:$8 sps:$4 sm:$0xff]  }
 0x150   :  { %1694 = vmatmul.mubr.bf16.vlgmr.msra.gmra.mrb[0].mxu0 %v3617_v40  ;;  %1866 = vmatmul.mubr.bf16.vlgmr.msra.gmra.mrb[0].mxu1 %v3617_v40 }
 0x151   :  { %2285 = vmatpush1.bf16.msra.mxu0 %v3618_v41  ;;  %3135 = vmatpush3.bf16.msra.mxu1 %v3715_v10  ;;  %v3692_v10 = vld [vmem:[#allocation7 + $0x184] ss:$8 sps:$4 sm:$0xff]  }
 0x152   :  { %2286 = vmatprep.subr.bf16.mxu0 %v3623_v42  ;;  %3136 = vmatprep.subr.bf16.mxu1 %v3716_v11  ;;  %v3690_v11 = vld [vmem:[#allocation7 + $0x180] ss:$8 sps:$4 sm:$0xff]  }
 0x155   :  { %2287 = vmatpush1.bf16.msra.mxu0 %v3621_v43  ;;  %3137 = vmatpush3.bf16.msra.mxu1 %v3717_v12  ;;  %v3695_v12 = vld [vmem:[#allocation7 + $0x194] ss:$8 sps:$4 sm:$0xff]  }
 0x156   :  { %2288 = vmatprep.subr.bf16.mxu0 %v3626_v44  ;;  %3138 = vmatprep.subr.bf16.mxu1 %v3718_v13  ;;  %v3693_v13 = vld [vmem:[#allocation7 + $0x190] ss:$8 sps:$4 sm:$0xff]  }
 0x159   :  { %2289 = vmatpush1.bf16.msra.mxu0 %v3624_v45  ;;  %3139 = vmatpush3.bf16.msra.mxu1 %v3719_v14  ;;  %v3698_v14 = vld [vmem:[#allocation7 + $0x1a4] ss:$8 sps:$4 sm:$0xff]  }
 0x15a   :  { %2290 = vmatprep.subr.bf16.mxu0 %v3629_v46  ;;  %3140 = vmatprep.subr.bf16.mxu1 %v3720_v15  ;;  %v3696_v15 = vld [vmem:[#allocation7 + $0x1a0] ss:$8 sps:$4 sm:$0xff]  }
 0x15d   :  { %2291 = vmatpush1.bf16.msra.mxu0 %v3627_v47  ;;  %3141 = vmatpush3.bf16.msra.mxu1 %v3721_v16  ;;  %v3701_v16 = vld [vmem:[#allocation7 + $0x1b4] ss:$8 sps:$4 sm:$0xff]  }
 0x15e   :  { %2292 = vmatprep.subr.bf16.mxu0 %v3632_v48  ;;  %3142 = vmatprep.subr.bf16.mxu1 %v3722_v17  ;;  %v3699_v17 = vld [vmem:[#allocation7 + $0x1b0] ss:$8 sps:$4 sm:$0xff]  }
 0x161   :  { %2293 = vmatpush1.bf16.msra.mxu0 %v3630_v49  ;;  %3143 = vmatpush3.bf16.msra.mxu1 %v3723_v18  ;;  %v3704_v18 = vld [vmem:[#allocation7 + $0x1c4] ss:$8 sps:$4 sm:$0xff]  }
 0x162   :  { %2294 = vmatprep.subr.bf16.mxu0 %v3635_v50  ;;  %3144 = vmatprep.subr.bf16.mxu1 %v3724_v19  ;;  %v3702_v19 = vld [vmem:[#allocation7 + $0x1c0] ss:$8 sps:$4 sm:$0xff]  }
 0x165   :  { %2295 = vmatpush1.bf16.msra.mxu0 %v3633_v51 }
 0x166   :  { %2296 = vmatprep.subr.bf16.mxu0 %v3638_v52 }
 0x169   :  { %2297 = vmatpush1.bf16.msra.mxu0 %v3636_v53 }
 0x16a   :  { %2298 = vmatprep.subr.bf16.mxu0 %v3641_v54 }
 0x16d   :  { %2299 = vmatpush1.bf16.msra.mxu0 %v3639_v55 }
 0x16e   :  { %2300 = vmatprep.subr.bf16.mxu0 %v3644_v56 }
 0x171   :  { %2301 = vmatpush1.bf16.msra.mxu0 %v3642_v57 }
 0x172   :  { %2302 = vmatprep.subr.bf16.mxu0 %v3647_v58 }
 0x175   :  { %2303 = vmatpush1.bf16.msra.mxu0 %v3645_v59  ;;  %v3666_v59 = vld [vmem:[#allocation7 + $0x100] ss:$8 sps:$4 sm:$0xff]  }
 0x176   :  { %2304 = vmatprep.subr.bf16.mxu0 %v3650_v60  ;;  %v3671_v60 = vld [vmem:[#allocation7 + $0x114] ss:$8 sps:$4 sm:$0xff]  }
 0x179   :  { %2305 = vmatpush1.bf16.msra.mxu0 %v3648_v61  ;;  %v3669_v61 = vld [vmem:[#allocation7 + $0x110] ss:$8 sps:$4 sm:$0xff]  }
 0x17a   :  { %2306 = vmatprep.subr.bf16.mxu0 %v3653_v62  ;;  %v3674_v62 = vld [vmem:[#allocation7 + $0x124] ss:$8 sps:$4 sm:$0xff]  }
 0x17d   :  { %2307 = vmatpush1.bf16.msra.mxu0 %v3651_v63  ;;  %v3672_v63 = vld [vmem:[#allocation7 + $0x120] ss:$8 sps:$4 sm:$0xff]  }
 0x17e   :  { %2308 = vmatprep.subr.bf16.mxu0 %v3656_v0  ;;  %v3677_v0 = vld [vmem:[#allocation7 + $0x134] ss:$8 sps:$4 sm:$0xff]  }
 0x181   :  { %2309 = vmatpush1.bf16.msra.mxu0 %v3654_v1  ;;  %v3675_v1 = vld [vmem:[#allocation7 + $0x130] ss:$8 sps:$4 sm:$0xff]  }
 0x182   :  { %2310 = vmatprep.subr.bf16.mxu0 %v3659_v2  ;;  %v3680_v2 = vld [vmem:[#allocation7 + $0x144] ss:$8 sps:$4 sm:$0xff]  }
 0x185   :  { %2311 = vmatpush1.bf16.msra.mxu0 %v3657_v3  ;;  %v3678_v3 = vld [vmem:[#allocation7 + $0x140] ss:$8 sps:$4 sm:$0xff]  }
 0x186   :  { %2312 = vmatprep.subr.bf16.mxu0 %v3662_v4  ;;  %v3683_v4 = vld [vmem:[#allocation7 + $0x154] ss:$8 sps:$4 sm:$0xff]  }
 0x189   :  { %2313 = vmatpush1.bf16.msra.mxu0 %v3660_v5  ;;  %v3681_v5 = vld [vmem:[#allocation7 + $0x150] ss:$8 sps:$4 sm:$0xff]  }
 0x18a   :  { %2314 = vmatprep.subr.bf16.mxu0 %v3665_v6  ;;  %v3686_v6 = vld [vmem:[#allocation7 + $0x164] ss:$8 sps:$4 sm:$0xff]  }
 0x18d   :  { %2315 = vmatpush1.bf16.msra.mxu0 %v3663_v7  ;;  %v3684_v7 = vld [vmem:[#allocation7 + $0x160] ss:$8 sps:$4 sm:$0xff]  }
 0x18e   :  { %2327 = vmatprep.subr.bf16.mxu0 %v3668_v8  ;;  %v3689_v8 = vld [vmem:[#allocation7 + $0x174] ss:$8 sps:$4 sm:$0xff]  }
 0x223   :  { %v1695_v31 = vpop.f32.mrb[0].mxu0  ;;  %v1867_v32 = vpop.f32.mrb[0].mxu1 }
 0x224   :  { %v3214_v33 = vadd.f32 %v1695_v31, %v359_v27  ;;  %v3218_v34 = vadd.f32 %v1867_v32, %v367_v28  ;;  %v1697_v35 = vpop.f32.mrb[1].mxu0  ;;  %v1869_v36 = vpop.f32.mrb[1].mxu1  ;;  %v3727_v31 = vld [vmem:[#allocation8 + $0x30] sm:$0xff]   ;;  %v3728_v32 = vld [vmem:[#allocation8 + $0x78] sm:$0xff]  }
 0x225   :  { %v3215_v37 = vadd.f32 %v1697_v35, %v363_v29  ;;  %v3219_v38 = vadd.f32 %v1869_v36, %v371_v30  ;;  %v1699_v39 = vpop.f32.mrb[2].mxu0  ;;  %v1871_v40 = vpop.f32.mrb[2].mxu1  ;;  %v1952_v35 = vld [vmem:[%s4150_s4] sm:$0x3] }
 0x226   :  { %v3216_v41 = vadd.f32 %v1699_v39, %v359_v27  ;;  %v3220_v42 = vadd.f32 %v1871_v40, %v367_v28  ;;  %v1701_v43 = vpop.f32.mrb[3].mxu0  ;;  %v1873_v44 = vpop.f32.mrb[3].mxu1  ;;  %v1876_v47 = vmax.f32 %v3214_v33, 0.0  ;;  %v1878_v48 = vmax.f32 %v3218_v34, 0.0  ;;  %v3713_v27 = vld [vmem:[#allocation7 + $0x1f4] ss:$8 sps:$4 sm:$0xff]  }
 0x227   :  { %v3217_v45 = vadd.f32 %v1701_v43, %v363_v29  ;;  %v3221_v46 = vadd.f32 %v1873_v44, %v371_v30  ;;  %v1877_v51 = vmax.f32 %v3215_v37, 0.0  ;;  %v1879_v52 = vmax.f32 %v3219_v38, 0.0  ;;  %v3711_v28 = vld [vmem:[#allocation7 + $0x1f0] ss:$8 sps:$4 sm:$0xff]   ;;  %v3725_v29 = vld [vmem:[#allocation8 + $0x28] sm:$0xff]  }
 0x228   :  { %v1880_v49 = vmax.f32 %v3216_v41, 0.0  ;;  %v1882_v50 = vmax.f32 %v3220_v42, 0.0  ;;  %3145 = vmatpush3.bf16.msra.mxu1 %v3725_v29  ;;  %v3726_v30 = vld [vmem:[#allocation8 + $0x70] sm:$0xff]   ;;  %v3729_v33 = vld [vmem:[#allocation8 + $0x38] sm:$0xff]   ;;  %v3925_v34 = vmov 0.0   ;;  %v1957_v36 = vrot.slane %v1952_v35, %v358_v22 }
 0x229   :  { %v1881_v53 = vmax.f32 %v3217_v45, 0.0  ;;  %v1883_v54 = vmax.f32 %v3221_v46, 0.0  ;;  %3146 = vmatprep.subr.bf16.mxu1 %v3726_v30  ;;  %v1961_v37 = vrot.slane %v1952_v35, %v362_v25  ;;  %v3732_v22 = vld [vmem:[#allocation10 + $0x10] sm:$0xff]   ;;  %v3733_v25 = vld [vmem:[#allocation10 + $0x18] sm:$0xff]  }
 0x22a   :  { %v1884_v55 = vpack.c.bf16 %v1880_v49, %v1876_v47  ;;  %v4092_v56 = vpack.c.bf16 %v1882_v50, %v1878_v48 }
 0x22b   :  { %v1885_v57 = vpack.c.bf16 %v1881_v53, %v1877_v51  ;;  %v1887_v58 = vpack.c.bf16 %v1883_v54, %v1879_v52  ;;  %v3730_v52 = vld [vmem:[#allocation10] sm:$0xff]   ;;  %v3735_v54 = vld [vmem:[#allocation10 + $0x28] sm:$0xff]  }
 0x22c   :  { %3147 = vmatpush3.bf16.msra.mxu1 %v3727_v31  ;;  %v3734_v53 = vld [vmem:[#allocation10 + $0x20] sm:$0xff]  }
 0x22d   :  { %2316 = vmatprep.mubr.bf16.mxu0 %v1885_v57  ;;  %3148 = vmatprep.subr.bf16.mxu1 %v3728_v32 }
 0x22e   :  { %2317 = vmatmul.mubr.bf16.vlgmr.msra.gmra.mrb[4].mxu0 %v1884_v55  ;;  %v3736_v55 = vld [vmem:[#allocation10 + $0x30] sm:$0xff]  }
 0x22f   :  { %2328 = vmatpush1.bf16.msra.mxu0 %v3666_v59  ;;  %2359 = vmatprep.mubr.bf16.mxu0 %v1887_v58  ;;  %v3099_v58 = vld [vmem:[%s4152_s6] ss:$0 sm:$0xff] }
 0x230   :  { %2329 = vmatprep.subr.bf16.mxu0 %v3671_v60  ;;  %3149 = vmatpush3.bf16.msra.mxu1 %v3729_v33 }
 0x231   :  { %3174 = vmatprep.subr.bf16.mxu1 %v3925_v34 }
 0x233   :  { %2330 = vmatpush1.bf16.msra.mxu0 %v3669_v61 }
 0x234   :  { %2331 = vmatprep.subr.bf16.mxu0 %v3674_v62 }
 0x237   :  { %2332 = vmatpush1.bf16.msra.mxu0 %v3672_v63 }
 0x238   :  { %2333 = vmatprep.subr.bf16.mxu0 %v3677_v0 }
 0x23b   :  { %2334 = vmatpush1.bf16.msra.mxu0 %v3675_v1 }
 0x23c   :  { %2335 = vmatprep.subr.bf16.mxu0 %v3680_v2 }
 0x23f   :  { %2336 = vmatpush1.bf16.msra.mxu0 %v3678_v3 }
 0x240   :  { %2337 = vmatprep.subr.bf16.mxu0 %v3683_v4  ;;  %v3738_v4 = vld [vmem:[#allocation11] sm:$0xff]  }
 0x243   :  { %2338 = vmatpush1.bf16.msra.mxu0 %v3681_v5 }
 0x244   :  { %2339 = vmatprep.subr.bf16.mxu0 %v3686_v6  ;;  %v3739_v6 = vld [vmem:[#allocation11 + $0x8] sm:$0xff]  }
 0x247   :  { %2340 = vmatpush1.bf16.msra.mxu0 %v3684_v7  ;;  %v3740_v7 = vld [vmem:[#allocation11 + $0x10] sm:$0xff]  }
 0x248   :  { %2341 = vmatprep.subr.bf16.mxu0 %v3689_v8  ;;  %v3741_v8 = vld [vmem:[#allocation11 + $0x18] sm:$0xff]  }
 0x24b   :  { %2342 = vmatpush1.bf16.msra.mxu0 %v3687_v9  ;;  %v3742_v9 = vld [vmem:[#allocation11 + $0x20] sm:$0xff]  }
 0x24c   :  { %2343 = vmatprep.subr.bf16.mxu0 %v3692_v10  ;;  %v3743_v10 = vld [vmem:[#allocation11 + $0x28] sm:$0xff]  }
 0x24f   :  { %2344 = vmatpush1.bf16.msra.mxu0 %v3690_v11  ;;  %v3744_v11 = vld [vmem:[#allocation11 + $0x30] sm:$0xff]  }
 0x250   :  { %2345 = vmatprep.subr.bf16.mxu0 %v3695_v12  ;;  %v3745_v12 = vld [vmem:[#allocation11 + $0x38] sm:$0xff]  }
 0x253   :  { %2346 = vmatpush1.bf16.msra.mxu0 %v3693_v13  ;;  %v3116_v13 = vld [vmem:[%s4154_s8] ss:$0 sm:$0xff]  ;;  %s3878_s8 = scalar_lea.vmem %s2790_s24, 256 }
 0x254   :  { %2347 = vmatprep.subr.bf16.mxu0 %v3698_v14  ;;  %p3879_p6 = scmp.ne.s32.totalorder %s2790_s24, %s3878_s8  ;;  %p3884_p8 = scmp.lt.s32.totalorder %s3878_s8, %s3878_s8 }
 0x256   :  { %p3885_p9 = por %p3884_p8, %p3883_p7 }
 0x257   :  { %2348 = vmatpush1.bf16.msra.mxu0 %v3696_v15 }
 0x258   :  { %2349 = vmatprep.subr.bf16.mxu0 %v3701_v16  ;;  %p3886_p10 = pnand %p3885_p9, %p3879_p6 }
 0x25b   :  { %2350 = vmatpush1.bf16.msra.mxu0 %v3699_v17 }
 0x25c   :  { %2351 = vmatprep.subr.bf16.mxu0 %v3704_v18 }
 0x25f   :  { %2352 = vmatpush1.bf16.msra.mxu0 %v3702_v19 }
 0x260   :  { %2353 = vmatprep.subr.bf16.mxu0 %v3707_v20 }
 0x263   :  { %2354 = vmatpush1.bf16.msra.mxu0 %v3705_v23 }
 0x264   :  { %2355 = vmatprep.subr.bf16.mxu0 %v3710_v24 }
 0x267   :  { %2356 = vmatpush1.bf16.msra.mxu0 %v3708_v26  ;;  %v3125_v26 = vld [vmem:[%s4156_s10] ss:$0 sm:$0xff] }
 0x268   :  { %2357 = vmatprep.subr.bf16.mxu0 %v3713_v27 }
 0x26b   :  { %2358 = vmatpush1.bf16.msra.mxu0 %v3711_v28 }
 0x26e   :  { %2360 = vmatmul.mubr.bf16.vlgmr.msra.gmra.mrb[4].mxu0 %v4092_v56  ;;  %v3737_v56 = vld [vmem:[#allocation10 + $0x38] sm:$0xff]  }
 0x341   :  { %v2361_v38 = vpop.f32.mrb[4].mxu0 }
 0x342   :  { %v3222_v39 = vadd.f32 %v2361_v38, %v1957_v36  ;;  %v2363_v40 = vpop.f32.mrb[5].mxu0 }
 0x343   :  { %v3223_v41 = vadd.f32 %v2363_v40, %v1961_v37  ;;  %v2365_v42 = vpop.f32.mrb[6].mxu0 }
 0x344   :  { %v3224_v43 = vadd.f32 %v2365_v42, %v1957_v36  ;;  %v2367_v44 = vpop.f32.mrb[7].mxu0  ;;  %v2370_v46 = vmax.f32 %v3222_v39, 0.0 }
 0x345   :  { %v3225_v45 = vadd.f32 %v2367_v44, %v1961_v37  ;;  %v2371_v48 = vmax.f32 %v3223_v41, 0.0 }
 0x346   :  { %v2372_v47 = vmax.f32 %v3224_v43, 0.0 }
 0x347   :  { %v2373_v49 = vmax.f32 %v3225_v45, 0.0 }
 0x348   :  { %v2374_v50 = vpack.c.bf16 %v2372_v47, %v2370_v46 }
 0x349   :  { %v2375_v51 = vpack.c.bf16 %v2373_v49, %v2371_v48 }
 0x34b   :  { %2543 = vmatprep.mubr.bf16.mxu1 %v2375_v51 }
 0x34c   :  { %2544 = vmatmul.mubr.bf16.vlgmr.msra.gmra.mrb[4].mxu1 %v2374_v50 }
 0x34d   :  { %3175 = vmatpush3.bf16.msra.mxu1 %v3730_v52  ;;  %3190 = vmatprep.mubr.msk.bf16.mxu1 %vm3926_vm0, %v3925_v34 }
 0x34e   :  { %3176 = vmatprep.subr.bf16.mxu1 %v3925_v34 }
 0x351   :  { %3177 = vmatpush3.bf16.msra.mxu1 %v3731_v21 }
 0x352   :  { %3178 = vmatprep.subr.bf16.mxu1 %v3925_v34 }
 0x355   :  { %3179 = vmatpush3.bf16.msra.mxu1 %v3732_v22 }
 0x356   :  { %3180 = vmatprep.subr.bf16.mxu1 %v3925_v34 }
 0x359   :  { %3181 = vmatpush3.bf16.msra.mxu1 %v3733_v25 }
 0x35a   :  { %3182 = vmatprep.subr.bf16.mxu1 %v3925_v34 }
 0x35d   :  { %3183 = vmatpush3.bf16.msra.mxu1 %v3734_v53 }
 0x35e   :  { %3184 = vmatprep.subr.bf16.mxu1 %v3925_v34 }
 0x361   :  { %3185 = vmatpush3.bf16.msra.mxu1 %v3735_v54 }
 0x362   :  { %3186 = vmatprep.subr.bf16.mxu1 %v3925_v34 }
 0x365   :  { %3187 = vmatpush3.bf16.msra.mxu1 %v3736_v55 }
 0x366   :  { %3188 = vmatprep.subr.bf16.mxu1 %v3925_v34 }
 0x369   :  { %3189 = vmatpush3.bf16.msra.mxu1 %v3737_v56 }
 0x36a   :  { %3194 = vmatprep.subr.bf16.mxu1 %v3925_v34 }
 0x41f   :  { %v3150_v57 = vpop.f32.mrb[4].mxu1 }
 0x420   :  { %v3151_v59 = vpop.f32.mrb[5].mxu1 }
 0x421   :  { %v3152_v60 = vadd.f32 %v3151_v59, %v3150_v57  ;;  %v3153_v61 = vpop.f32.mrb[6].mxu1 }
 0x422   :  { %v3154_v62 = vpop.f32.mrb[7].mxu1 }
 0x423   :  { %v2546_v63 = vadd.f32 %v3152_v60, %v3099_v58  ;;  %v3155_v0 = vadd.f32 %v3154_v62, %v3153_v61 }
 0x425   :  { %v2549_v1 = vadd.f32 %v3155_v0, %v3099_v58  ;;  %v2552_v2 = vmax.f32 %v2546_v63, 0.0 }
 0x427   :  { %v2553_v3 = vmax.f32 %v2549_v1, 0.0 }
 0x429   :  { %v2554_v5 = vpack.c.bf16 %v2553_v3, %v2552_v2 }
 0x42b   :  { %3191 = vmatmul.mubr.bf16.vlgmr.msra.gmra.mrb[8].mxu1 %v2554_v5 }
 0x42c   :  { %3195 = vmatpush3.bf16.msra.mxu1 %v3738_v4  ;;  %3210 = vmatprep.mubr.msk.bf16.mxu1 %vm3926_vm0, %v3925_v34 }
 0x42d   :  { %3196 = vmatprep.subr.bf16.mxu1 %v3925_v34 }
 0x430   :  { %3197 = vmatpush3.bf16.msra.mxu1 %v3739_v6 }
 0x431   :  { %3198 = vmatprep.subr.bf16.mxu1 %v3925_v34 }
 0x434   :  { %3199 = vmatpush3.bf16.msra.mxu1 %v3740_v7 }
 0x435   :  { %3200 = vmatprep.subr.bf16.mxu1 %v3925_v34 }
 0x438   :  { %3201 = vmatpush3.bf16.msra.mxu1 %v3741_v8 }
 0x439   :  { %3202 = vmatprep.subr.bf16.mxu1 %v3925_v34 }
 0x43c   :  { %3203 = vmatpush3.bf16.msra.mxu1 %v3742_v9 }
 0x43d   :  { %3204 = vmatprep.subr.bf16.mxu1 %v3925_v34 }
 0x440   :  { %3205 = vmatpush3.bf16.msra.mxu1 %v3743_v10 }
 0x441   :  { %3206 = vmatprep.subr.bf16.mxu1 %v3925_v34 }
 0x444   :  { %3207 = vmatpush3.bf16.msra.mxu1 %v3744_v11 }
 0x445   :  { %3208 = vmatprep.subr.bf16.mxu1 %v3925_v34 }
 0x448   :  { %3209 = vmatpush3.bf16.msra.mxu1 %v3745_v12 }
 0x4fe   :  { %v2660_v14 = vpop.f32.mrb[8].mxu1 }
 0x4ff   :  { %v2661_v15 = vadd.f32 %v3116_v13, %v2660_v14  ;;  %v3192_v16 = vpop.f32.mrb[9].mxu1 }
 0x500   :  { %v2663_v17 = vpop.f32.mrb[10].mxu1 }
 0x501   :  { %v2664_v18 = vadd.f32 %v3116_v13, %v2663_v17  ;;  %v3193_v19 = vpop.f32.mrb[11].mxu1  ;;  %v2667_v20 = vmax.f32 %v2661_v15, 0.0 }
 0x503   :  { %v2668_v23 = vmax.f32 %v2664_v18, 0.0 }
 0x505   :  { %v2669_v24 = vpack.c.bf16 %v2668_v23, %v2667_v20 }
 0x507   :  { %3211 = vmatmul.mubr.bf16.vlgmr.msra.gmra.mrb[12].mxu1 %v2669_v24 }
 0x5da   :  { %v2775_v27 = vpop.f32.mrb[12].mxu1 }
 0x5db   :  { %v2776_v28 = vadd.f32 %v3125_v26, %v2775_v27  ;;  %v3212_v29 = vpop.f32.mrb[13].mxu1 }
 0x5dc   :  { %v2778_v30 = vpop.f32.mrb[14].mxu1 }
 0x5dd   :  { %2782 = vst [vmem:[#allocation13] sm:$0xff] %v2776_v28  ;;  %v2779_v31 = vadd.f32 %v3125_v26, %v2778_v30  ;;  %v3213_v32 = vpop.f32.mrb[15].mxu1 }
 0x5df   :  { %2783 = vst [vmem:[#allocation13 + $0x8] sm:$0xff] %v2779_v31 }
 0x5e0   :  { %3889 = shalt.err (!%p3886_p10)
}
 0x5e1   :  { %s3890_s3 = scalar_lea.hbm %s4157_s11, 256 }
 0x5e2   :  { %p3891_p11 = scmp.ne.s32.totalorder %s4157_s11, %s3890_s3  ;;  %p3894_p12 = scmp.lt.u32.totalorder %s3890_s3, %s4157_s11 }
 0x5e4   :  { %p3896_p13 = pnand %p3894_p12, %p3891_p11 }
 0x5e6   :  { %3899 = shalt.err (!%p3896_p13)
}
 0x5e7   :  { %2795 = dma.vmem_to_hbm [thread:$0]  %s2790_s24, 256, %s4157_s11, [#allocation4], %s3920_s0, %s3920_s0, %s3921_s26  }
 0x5e8   :  { %3908 = dma.done.wait [#allocation4], 256  }
 0x5e9   :  { %3909 = vsyncadd [#allocation4], 4294967040 }
 0x5ea   :  { %2799 = vsyncpa [#allocation3], 1 }
 0x5eb   :  { %2800 = vsyncpa [#allocation6], 1 }
 0x5ec   :  { %2801 = vsyncpa [#allocation9], 1 }
 0x5ed   :  { %2802 = vsyncpa [#allocation12], 1 }
 0x5ee   :  { %2803 = vsyncpa [#allocation4], 1 }

</bundles_post_ra>
